<compile_context>
chip_gen: v6e
topology: v6e:2x2x1
jax: 0.10.0
libtpu: 0.0.40
codegen_flags: <defaults>
</compile_context>

<pallas_src>
import functools

import jax
import jax.numpy as jnp
from jax.experimental import pallas as pl
from jax.experimental.pallas import tpu as pltpu


# ---------------------------------------------------------------------------
# Kernel
# ---------------------------------------------------------------------------
def _encoder_kernel(*refs, layer_meta, n_inputs, eps):
    """refs = (x_ref, *per_layer_refs..., o_ref).

    Per-layer refs (packed to minimize the number of input DMAs):
      wb : (3, W*Cin, W*Cout)        banded conv weights, one per vertical tap
      sh : (2, NH, NH)               [0] row shift "down" (reads y-1, zero at y==0)
                                     [1] row shift "up"   (reads y+1, zero at y==H-1)
      gg : (W*Cout, W*Cout)          per-channel sum + tile-back matrix
      pp : (3, 1, W*Cout)            [0] conv bias, [1] BN gamma, [2] BN beta (lane-tiled)
      [if pooled]
      pr : (2, N*(H//2), NH)         even/odd row selectors
      pc : (2, W*Cout, (W//2)*Cout)  even/odd column selectors
    """
    o_ref = refs[n_inputs]
    act = refs[0][...]                                     # (N*H0, W0*C0) f32
    idx = 1
    f32 = jnp.float32

    for (NH, _H, W, _Cin, _Cout, do_pool) in layer_meta:
        wb_ref = refs[idx]
        sh_ref = refs[idx + 1]
        gg = refs[idx + 2][...]
        pp_ref = refs[idx + 3]
        idx += 4

        b_l = pp_ref[0]                                    # (1, W*Cout)
        g_l = pp_ref[1]
        be_l = pp_ref[2]

        # ---- conv3x3, "same" padding folded into the banded weights ---------
        act_dn = jnp.dot(sh_ref[0], act, preferred_element_type=f32)   # rows y-1
        act_up = jnp.dot(sh_ref[1], act, preferred_element_type=f32)   # rows y+1
        conv = (jnp.dot(act_dn, wb_ref[0], preferred_element_type=f32)
                + jnp.dot(act, wb_ref[1], preferred_element_type=f32)
                + jnp.dot(act_up, wb_ref[2], preferred_element_type=f32)
                + b_l)                                     # (NH, W*Cout)

        # ---- BatchNorm2d (train-mode biased batch stats), stats on the MXU --
        ones_row = jnp.ones((1, NH), f32)
        s1 = jnp.dot(ones_row, conv, preferred_element_type=f32)          # (1, W*C)
        s2 = jnp.dot(ones_row, conv * conv, preferred_element_type=f32)   # (1, W*C)
        inv_cnt = 1.0 / float(NH * W)                      # 1 / (N*H*W)
        mean_l = jnp.dot(s1, gg, preferred_element_type=f32) * inv_cnt
        ex2_l = jnp.dot(s2, gg, preferred_element_type=f32) * inv_cnt
        var_l = ex2_l - mean_l * mean_l
        scale_l = g_l * jax.lax.rsqrt(var_l + eps)
        shift_l = be_l - mean_l * scale_l
        y = jnp.maximum(conv * scale_l + shift_l, 0.0)     # fused BN + ReLU

        # ---- MaxPool2d(2): exact 0/1 selection matmuls + element maxima ------
        if do_pool:
            pr_ref = refs[idx]
            pc_ref = refs[idx + 1]
            idx += 2
            yr = jnp.maximum(jnp.dot(pr_ref[0], y, preferred_element_type=f32),
                             jnp.dot(pr_ref[1], y, preferred_element_type=f32))
            y = jnp.maximum(jnp.dot(yr, pc_ref[0], preferred_element_type=f32),
                            jnp.dot(yr, pc_ref[1], preferred_element_type=f32))
        act = y

    o_ref[...] = act.astype(o_ref.dtype)


# ---------------------------------------------------------------------------
# Host-side precomputation of the small constant matrices (plain JAX)
# ---------------------------------------------------------------------------
def _banded_conv_weights(w, W):
    """w: (3, 3, Cin, Cout) HWIO -> (3, W*Cin, W*Cout).

    Horizontal taps and horizontal zero-padding are folded in: entry
    [(x+dx-1)*Cin+ci, x*Cout+co] = w[dy, dx, ci, co], omitted when out of range.
    """
    taps = []
    for dy in range(3):
        acc = None
        for dx in range(3):
            s = jnp.eye(W, k=1 - dx, dtype=jnp.float32)  # s[xin, x]=1 iff xin==x+dx-1
            blk = jnp.kron(s, w[dy, dx].astype(jnp.float32))
            acc = blk if acc is None else acc + blk
        taps.append(acc)
    return jnp.stack(taps, axis=0)


def _row_shift_mats(N, H):
    NH = N * H
    r = jnp.arange(NH)
    # (dmat @ act)[r] = act[r-1], zero at y==0 (per image)
    dmat = ((r[:, None] - 1 == r[None, :]) & ((r % H) != 0)[:, None]).astype(jnp.float32)
    # (umat @ act)[r] = act[r+1], zero at y==H-1 (per image)
    umat = ((r[:, None] + 1 == r[None, :]) & ((r % H) != H - 1)[:, None]).astype(jnp.float32)
    return jnp.stack([dmat, umat], axis=0)                 # (2, NH, NH)


def _pool_row_mats(N, H):
    Hp = H // 2
    rout = jnp.arange(N * Hp)
    n, y2 = rout // Hp, rout % Hp
    rin = jnp.arange(N * H)[None, :]
    re = (rin == (n * H + 2 * y2)[:, None]).astype(jnp.float32)
    ro = (rin == (n * H + 2 * y2 + 1)[:, None]).astype(jnp.float32)
    return jnp.stack([re, ro], axis=0)                     # (2, N*Hp, N*H)


def _pool_col_mats(W, C):
    Wp = W // 2
    xin = jnp.arange(W)[:, None]
    xo = jnp.arange(Wp)[None, :]
    eye_c = jnp.eye(C, dtype=jnp.float32)
    ce = jnp.kron((xin == 2 * xo).astype(jnp.float32), eye_c)
    co = jnp.kron((xin == 2 * xo + 1).astype(jnp.float32), eye_c)
    return jnp.stack([ce, co], axis=0)                     # (2, W*C, Wp*C)


# ---------------------------------------------------------------------------
# Public wrapper (accepts NCHW like PyTorch)
# ---------------------------------------------------------------------------
def encoder_forward(x_nchw, params, eps=1e-5):
    """params: list of (w(3,3,Cin,Cout) HWIO, bias(Cout,), gamma(Cout,), beta(Cout,))."""
    N, C0, H, W = x_nchw.shape
    # NCHW -> lane-dense (N*H, W*C)
    x2d = jnp.transpose(x_nchw, (0, 2, 3, 1)).reshape(N * H, W * C0).astype(jnp.float32)

    n_layers = len(params)
    op_list = [x2d]
    layer_meta = []
    h, w_sp, cin = H, W, C0
    for i, (w, b, g, beta) in enumerate(params):
        cout = w.shape[-1]
        do_pool = i < n_layers - 1
        nh = N * h
        gg = jnp.kron(jnp.ones((w_sp, w_sp), jnp.float32), jnp.eye(cout, dtype=jnp.float32))
        pp = jnp.stack([
            jnp.tile(b.astype(jnp.float32), w_sp).reshape(1, -1),
            jnp.tile(g.astype(jnp.float32), w_sp).reshape(1, -1),
            jnp.tile(beta.astype(jnp.float32), w_sp).reshape(1, -1),
        ], axis=0)                                         # (3, 1, W*Cout)
        op_list += [
            _banded_conv_weights(w, w_sp),                 # (3, W*Cin, W*Cout)
            _row_shift_mats(N, h),                         # (2, NH, NH)
            gg,                                            # (W*Cout, W*Cout)
            pp,                                            # (3, 1, W*Cout)
        ]
        layer_meta.append((nh, h, w_sp, cin, cout, do_pool))
        if do_pool:
            op_list += [_pool_row_mats(N, h), _pool_col_mats(w_sp, cout)]
            h, w_sp = h // 2, w_sp // 2
        cin = cout

    kernel = functools.partial(_encoder_kernel, layer_meta=tuple(layer_meta),
                               n_inputs=len(op_list), eps=float(eps))
    vmem = pl.BlockSpec(memory_space=pltpu.MemorySpace.VMEM)
    out2d = pl.pallas_call(
        kernel,
        out_shape=jax.ShapeDtypeStruct((N * h, w_sp * cin), jnp.float32),
        in_specs=[vmem] * len(op_list),
        out_specs=vmem,
        compiler_params=pltpu.CompilerParams(vmem_limit_bytes=32 * 1024 * 1024),
    )(*op_list)

    # undo the lane-dense flattening: (N*Hf, Wf*Cf) -> NCHW
    out = out2d.reshape(N, h, w_sp, cin)
    return jnp.transpose(out, (0, 3, 1, 2))


# ---------------------------------------------------------------------------
# Pure-JAX reference (for correctness check only)
# ---------------------------------------------------------------------------
def _encoder_reference(x_nchw, params, eps=1e-5):
    x = jnp.transpose(x_nchw, (0, 2, 3, 1))
    n = len(params)
    for i, (w, b, g, beta) in enumerate(params):
        y = jax.lax.conv_general_dilated(
            x, w, window_strides=(1, 1), padding="SAME",
            dimension_numbers=("NHWC", "HWIO", "NHWC"))
        y = y + b.reshape(1, 1, 1, -1)
        mean = jnp.mean(y, axis=(0, 1, 2), keepdims=True)
        var = jnp.mean((y - mean) ** 2, axis=(0, 1, 2), keepdims=True)
        y = (y - mean) * jax.lax.rsqrt(var + eps)
        y = y * g.reshape(1, 1, 1, -1) + beta.reshape(1, 1, 1, -1)
        y = jnp.maximum(y, 0.0)
        if i < n - 1:
            y = jax.lax.reduce_window(y, -jnp.inf, jax.lax.max,
                                      (1, 2, 2, 1), (1, 2, 2, 1), "VALID")
        x = y
    return jnp.transpose(x, (0, 3, 1, 2))


if __name__ == "__main__":
    key = jax.random.PRNGKey(0)
    num_kernels = [4, 8, 16]    # Encoder([4, 8, 16], kernel_size=3, bn=True, max_pool=True)
    N, H, W = 2, 16, 16

    key, kx = jax.random.split(key)
    x = jax.random.normal(kx, (N, num_kernels[0], H, W), jnp.float32)   # NCHW input

    params = []
    for i in range(len(num_kernels) - 1):
        cin, cout = num_kernels[i], num_kernels[i + 1]
        key, k1, k2, k3, k4 = jax.random.split(key, 5)
        w = jax.random.normal(k1, (3, 3, cin, cout), jnp.float32) / jnp.sqrt(9.0 * cin)
        b = 0.1 * jax.random.normal(k2, (cout,), jnp.float32)
        g = 1.0 + 0.1 * jax.random.normal(k3, (cout,), jnp.float32)     # BN weight
        beta = 0.1 * jax.random.normal(k4, (cout,), jnp.float32)        # BN bias
        params.append((w, b, g, beta))

    out = encoder_forward(x, params)
    out = jax.block_until_ready(out)

    assert out.shape == (N, num_kernels[-1], H // 2, W // 2), out.shape

    ref = _encoder_reference(x, params)
    if jnp.allclose(out, ref, atol=1e-3, rtol=1e-3):
        print("KERNEL_OK")
    else:
        print("MISMATCH max_abs_err=", float(jnp.max(jnp.abs(out - ref))))
</pallas_src>

<mosaic_0001>
module attributes {stable_mosaic.version = 11 : i64} {
  func.func @_encoder_kernel(%arg0: memref<32x64xf32, #tpu.memory_space<vmem>>, %arg1: memref<3x64x128xf32, #tpu.memory_space<vmem>>, %arg2: memref<2x32x32xf32, #tpu.memory_space<vmem>>, %arg3: memref<128x128xf32, #tpu.memory_space<vmem>>, %arg4: memref<3x1x128xf32, #tpu.memory_space<vmem>>, %arg5: memref<2x16x32xf32, #tpu.memory_space<vmem>>, %arg6: memref<2x128x64xf32, #tpu.memory_space<vmem>>, %arg7: memref<3x64x128xf32, #tpu.memory_space<vmem>>, %arg8: memref<2x16x16xf32, #tpu.memory_space<vmem>>, %arg9: memref<128x128xf32, #tpu.memory_space<vmem>>, %arg10: memref<3x1x128xf32, #tpu.memory_space<vmem>>, %arg11: memref<16x128xf32, #tpu.memory_space<vmem>>) attributes {dimension_semantics = [], scalar_prefetch = 0 : i64, scratch_operands = 0 : i64, tpu.core_type = #tpu.core_type<tc>} {
    %c0 = arith.constant 0 : index
    %c0_0 = arith.constant 0 : index
    %0 = vector.load %arg0[%c0, %c0_0] : memref<32x64xf32, #tpu.memory_space<vmem>>, vector<32x64xf32>
    %c0_1 = arith.constant 0 : index
    %c0_2 = arith.constant 0 : index
    %1 = vector.load %arg3[%c0_1, %c0_2] : memref<128x128xf32, #tpu.memory_space<vmem>>, vector<128x128xf32>
    %c0_3 = arith.constant 0 : index
    %c0_4 = arith.constant 0 : index
    %c0_5 = arith.constant 0 : index
    %2 = vector.load %arg4[%c0_3, %c0_4, %c0_5] : memref<3x1x128xf32, #tpu.memory_space<vmem>>, vector<1x1x128xf32>
    %3 = vector.shape_cast %2 : vector<1x1x128xf32> to vector<1x128xf32>
    %c1 = arith.constant 1 : index
    %c0_6 = arith.constant 0 : index
    %c0_7 = arith.constant 0 : index
    %4 = vector.load %arg4[%c1, %c0_6, %c0_7] : memref<3x1x128xf32, #tpu.memory_space<vmem>>, vector<1x1x128xf32>
    %5 = vector.shape_cast %4 : vector<1x1x128xf32> to vector<1x128xf32>
    %c2 = arith.constant 2 : index
    %c0_8 = arith.constant 0 : index
    %c0_9 = arith.constant 0 : index
    %6 = vector.load %arg4[%c2, %c0_8, %c0_9] : memref<3x1x128xf32, #tpu.memory_space<vmem>>, vector<1x1x128xf32>
    %7 = vector.shape_cast %6 : vector<1x1x128xf32> to vector<1x128xf32>
    %c0_10 = arith.constant 0 : index
    %c0_11 = arith.constant 0 : index
    %c0_12 = arith.constant 0 : index
    %8 = vector.load %arg2[%c0_10, %c0_11, %c0_12] : memref<2x32x32xf32, #tpu.memory_space<vmem>>, vector<1x32x32xf32>
    %9 = vector.shape_cast %8 : vector<1x32x32xf32> to vector<32x32xf32>
    %cst = arith.constant dense<0.000000e+00> : vector<32x64xf32>
    %10 = tpu.matmul %9, %0, %cst {dimension_numbers = #tpu.dot_dimension_numbers<[1], [0], [0], [1], [0, 0, 1, 1], [], []>} : vector<32x32xf32>, vector<32x64xf32>, vector<32x64xf32> -> vector<32x64xf32>
    %c1_13 = arith.constant 1 : index
    %c0_14 = arith.constant 0 : index
    %c0_15 = arith.constant 0 : index
    %11 = vector.load %arg2[%c1_13, %c0_14, %c0_15] : memref<2x32x32xf32, #tpu.memory_space<vmem>>, vector<1x32x32xf32>
    %12 = vector.shape_cast %11 : vector<1x32x32xf32> to vector<32x32xf32>
    %cst_16 = arith.constant dense<0.000000e+00> : vector<32x64xf32>
    %13 = tpu.matmul %12, %0, %cst_16 {dimension_numbers = #tpu.dot_dimension_numbers<[1], [0], [0], [1], [0, 0, 1, 1], [], []>} : vector<32x32xf32>, vector<32x64xf32>, vector<32x64xf32> -> vector<32x64xf32>
    %c0_17 = arith.constant 0 : index
    %c0_18 = arith.constant 0 : index
    %c0_19 = arith.constant 0 : index
    %14 = vector.load %arg1[%c0_17, %c0_18, %c0_19] : memref<3x64x128xf32, #tpu.memory_space<vmem>>, vector<1x64x128xf32>
    %15 = vector.shape_cast %14 : vector<1x64x128xf32> to vector<64x128xf32>
    %cst_20 = arith.constant dense<0.000000e+00> : vector<32x128xf32>
    %16 = tpu.matmul %10, %15, %cst_20 {dimension_numbers = #tpu.dot_dimension_numbers<[1], [0], [0], [1], [0, 0, 1, 1], [], []>} : vector<32x64xf32>, vector<64x128xf32>, vector<32x128xf32> -> vector<32x128xf32>
    %c1_21 = arith.constant 1 : index
    %c0_22 = arith.constant 0 : index
    %c0_23 = arith.constant 0 : index
    %17 = vector.load %arg1[%c1_21, %c0_22, %c0_23] : memref<3x64x128xf32, #tpu.memory_space<vmem>>, vector<1x64x128xf32>
    %18 = vector.shape_cast %17 : vector<1x64x128xf32> to vector<64x128xf32>
    %cst_24 = arith.constant dense<0.000000e+00> : vector<32x128xf32>
    %19 = tpu.matmul %0, %18, %cst_24 {dimension_numbers = #tpu.dot_dimension_numbers<[1], [0], [0], [1], [0, 0, 1, 1], [], []>} : vector<32x64xf32>, vector<64x128xf32>, vector<32x128xf32> -> vector<32x128xf32>
    %20 = arith.addf %16, %19 : vector<32x128xf32>
    %c2_25 = arith.constant 2 : index
    %c0_26 = arith.constant 0 : index
    %c0_27 = arith.constant 0 : index
    %21 = vector.load %arg1[%c2_25, %c0_26, %c0_27] : memref<3x64x128xf32, #tpu.memory_space<vmem>>, vector<1x64x128xf32>
    %22 = vector.shape_cast %21 : vector<1x64x128xf32> to vector<64x128xf32>
    %cst_28 = arith.constant dense<0.000000e+00> : vector<32x128xf32>
    %23 = tpu.matmul %13, %22, %cst_28 {dimension_numbers = #tpu.dot_dimension_numbers<[1], [0], [0], [1], [0, 0, 1, 1], [], []>} : vector<32x64xf32>, vector<64x128xf32>, vector<32x128xf32> -> vector<32x128xf32>
    %24 = arith.addf %20, %23 : vector<32x128xf32>
    %25 = vector.broadcast %3 : vector<1x128xf32> to vector<32x128xf32>
    %26 = arith.addf %24, %25 : vector<32x128xf32>
    %cst_29 = arith.constant 1.000000e+00 : f32
    %27 = vector.broadcast %cst_29 : f32 to vector<1x32xf32>
    %cst_30 = arith.constant dense<0.000000e+00> : vector<1x128xf32>
    %28 = tpu.matmul %27, %26, %cst_30 {dimension_numbers = #tpu.dot_dimension_numbers<[1], [0], [0], [1], [0, 0, 1, 1], [], []>} : vector<1x32xf32>, vector<32x128xf32>, vector<1x128xf32> -> vector<1x128xf32>
    %29 = arith.mulf %26, %26 : vector<32x128xf32>
    %cst_31 = arith.constant dense<0.000000e+00> : vector<1x128xf32>
    %30 = tpu.matmul %27, %29, %cst_31 {dimension_numbers = #tpu.dot_dimension_numbers<[1], [0], [0], [1], [0, 0, 1, 1], [], []>} : vector<1x32xf32>, vector<32x128xf32>, vector<1x128xf32> -> vector<1x128xf32>
    %cst_32 = arith.constant dense<0.000000e+00> : vector<1x128xf32>
    %31 = tpu.matmul %28, %1, %cst_32 {dimension_numbers = #tpu.dot_dimension_numbers<[1], [0], [0], [1], [0, 0, 1, 1], [], []>} : vector<1x128xf32>, vector<128x128xf32>, vector<1x128xf32> -> vector<1x128xf32>
    %cst_33 = arith.constant 0.001953125 : f32
    %32 = vector.broadcast %cst_33 : f32 to vector<1x128xf32>
    %33 = arith.mulf %31, %32 : vector<1x128xf32>
    %cst_34 = arith.constant dense<0.000000e+00> : vector<1x128xf32>
    %34 = tpu.matmul %30, %1, %cst_34 {dimension_numbers = #tpu.dot_dimension_numbers<[1], [0], [0], [1], [0, 0, 1, 1], [], []>} : vector<1x128xf32>, vector<128x128xf32>, vector<1x128xf32> -> vector<1x128xf32>
    %cst_35 = arith.constant 0.001953125 : f32
    %35 = vector.broadcast %cst_35 : f32 to vector<1x128xf32>
    %36 = arith.mulf %34, %35 : vector<1x128xf32>
    %37 = arith.mulf %33, %33 : vector<1x128xf32>
    %38 = arith.subf %36, %37 : vector<1x128xf32>
    %cst_36 = arith.constant 9.99999974E-6 : f32
    %39 = vector.broadcast %cst_36 : f32 to vector<1x128xf32>
    %40 = arith.addf %38, %39 : vector<1x128xf32>
    %41 = math.rsqrt %40 : vector<1x128xf32>
    %42 = arith.mulf %5, %41 : vector<1x128xf32>
    %43 = arith.mulf %33, %42 : vector<1x128xf32>
    %44 = arith.subf %7, %43 : vector<1x128xf32>
    %45 = vector.broadcast %42 : vector<1x128xf32> to vector<32x128xf32>
    %46 = arith.mulf %26, %45 : vector<32x128xf32>
    %47 = vector.broadcast %44 : vector<1x128xf32> to vector<32x128xf32>
    %48 = arith.addf %46, %47 : vector<32x128xf32>
    %cst_37 = arith.constant 0.000000e+00 : f32
    %49 = vector.broadcast %cst_37 : f32 to vector<32x128xf32>
    %50 = arith.maximumf %48, %49 : vector<32x128xf32>
    %c0_38 = arith.constant 0 : index
    %c0_39 = arith.constant 0 : index
    %c0_40 = arith.constant 0 : index
    %51 = vector.load %arg5[%c0_38, %c0_39, %c0_40] : memref<2x16x32xf32, #tpu.memory_space<vmem>>, vector<1x16x32xf32>
    %52 = vector.shape_cast %51 : vector<1x16x32xf32> to vector<16x32xf32>
    %cst_41 = arith.constant dense<0.000000e+00> : vector<16x128xf32>
    %53 = tpu.matmul %52, %50, %cst_41 {dimension_numbers = #tpu.dot_dimension_numbers<[1], [0], [0], [1], [0, 0, 1, 1], [], []>} : vector<16x32xf32>, vector<32x128xf32>, vector<16x128xf32> -> vector<16x128xf32>
    %c1_42 = arith.constant 1 : index
    %c0_43 = arith.constant 0 : index
    %c0_44 = arith.constant 0 : index
    %54 = vector.load %arg5[%c1_42, %c0_43, %c0_44] : memref<2x16x32xf32, #tpu.memory_space<vmem>>, vector<1x16x32xf32>
    %55 = vector.shape_cast %54 : vector<1x16x32xf32> to vector<16x32xf32>
    %cst_45 = arith.constant dense<0.000000e+00> : vector<16x128xf32>
    %56 = tpu.matmul %55, %50, %cst_45 {dimension_numbers = #tpu.dot_dimension_numbers<[1], [0], [0], [1], [0, 0, 1, 1], [], []>} : vector<16x32xf32>, vector<32x128xf32>, vector<16x128xf32> -> vector<16x128xf32>
    %57 = arith.maximumf %53, %56 : vector<16x128xf32>
    %c0_46 = arith.constant 0 : index
    %c0_47 = arith.constant 0 : index
    %c0_48 = arith.constant 0 : index
    %58 = vector.load %arg6[%c0_46, %c0_47, %c0_48] : memref<2x128x64xf32, #tpu.memory_space<vmem>>, vector<1x128x64xf32>
    %59 = vector.shape_cast %58 : vector<1x128x64xf32> to vector<128x64xf32>
    %cst_49 = arith.constant dense<0.000000e+00> : vector<16x64xf32>
    %60 = tpu.matmul %57, %59, %cst_49 {dimension_numbers = #tpu.dot_dimension_numbers<[1], [0], [0], [1], [0, 0, 1, 1], [], []>} : vector<16x128xf32>, vector<128x64xf32>, vector<16x64xf32> -> vector<16x64xf32>
    %c1_50 = arith.constant 1 : index
    %c0_51 = arith.constant 0 : index
    %c0_52 = arith.constant 0 : index
    %61 = vector.load %arg6[%c1_50, %c0_51, %c0_52] : memref<2x128x64xf32, #tpu.memory_space<vmem>>, vector<1x128x64xf32>
    %62 = vector.shape_cast %61 : vector<1x128x64xf32> to vector<128x64xf32>
    %cst_53 = arith.constant dense<0.000000e+00> : vector<16x64xf32>
    %63 = tpu.matmul %57, %62, %cst_53 {dimension_numbers = #tpu.dot_dimension_numbers<[1], [0], [0], [1], [0, 0, 1, 1], [], []>} : vector<16x128xf32>, vector<128x64xf32>, vector<16x64xf32> -> vector<16x64xf32>
    %64 = arith.maximumf %60, %63 : vector<16x64xf32>
    %c0_54 = arith.constant 0 : index
    %c0_55 = arith.constant 0 : index
    %65 = vector.load %arg9[%c0_54, %c0_55] : memref<128x128xf32, #tpu.memory_space<vmem>>, vector<128x128xf32>
    %c0_56 = arith.constant 0 : index
    %c0_57 = arith.constant 0 : index
    %c0_58 = arith.constant 0 : index
    %66 = vector.load %arg10[%c0_56, %c0_57, %c0_58] : memref<3x1x128xf32, #tpu.memory_space<vmem>>, vector<1x1x128xf32>
    %67 = vector.shape_cast %66 : vector<1x1x128xf32> to vector<1x128xf32>
    %c1_59 = arith.constant 1 : index
    %c0_60 = arith.constant 0 : index
    %c0_61 = arith.constant 0 : index
    %68 = vector.load %arg10[%c1_59, %c0_60, %c0_61] : memref<3x1x128xf32, #tpu.memory_space<vmem>>, vector<1x1x128xf32>
    %69 = vector.shape_cast %68 : vector<1x1x128xf32> to vector<1x128xf32>
    %c2_62 = arith.constant 2 : index
    %c0_63 = arith.constant 0 : index
    %c0_64 = arith.constant 0 : index
    %70 = vector.load %arg10[%c2_62, %c0_63, %c0_64] : memref<3x1x128xf32, #tpu.memory_space<vmem>>, vector<1x1x128xf32>
    %71 = vector.shape_cast %70 : vector<1x1x128xf32> to vector<1x128xf32>
    %c0_65 = arith.constant 0 : index
    %c0_66 = arith.constant 0 : index
    %c0_67 = arith.constant 0 : index
    %72 = vector.load %arg8[%c0_65, %c0_66, %c0_67] : memref<2x16x16xf32, #tpu.memory_space<vmem>>, vector<1x16x16xf32>
    %73 = vector.shape_cast %72 : vector<1x16x16xf32> to vector<16x16xf32>
    %cst_68 = arith.constant dense<0.000000e+00> : vector<16x64xf32>
    %74 = tpu.matmul %73, %64, %cst_68 {dimension_numbers = #tpu.dot_dimension_numbers<[1], [0], [0], [1], [0, 0, 1, 1], [], []>} : vector<16x16xf32>, vector<16x64xf32>, vector<16x64xf32> -> vector<16x64xf32>
    %c1_69 = arith.constant 1 : index
    %c0_70 = arith.constant 0 : index
    %c0_71 = arith.constant 0 : index
    %75 = vector.load %arg8[%c1_69, %c0_70, %c0_71] : memref<2x16x16xf32, #tpu.memory_space<vmem>>, vector<1x16x16xf32>
    %76 = vector.shape_cast %75 : vector<1x16x16xf32> to vector<16x16xf32>
    %cst_72 = arith.constant dense<0.000000e+00> : vector<16x64xf32>
    %77 = tpu.matmul %76, %64, %cst_72 {dimension_numbers = #tpu.dot_dimension_numbers<[1], [0], [0], [1], [0, 0, 1, 1], [], []>} : vector<16x16xf32>, vector<16x64xf32>, vector<16x64xf32> -> vector<16x64xf32>
    %c0_73 = arith.constant 0 : index
    %c0_74 = arith.constant 0 : index
    %c0_75 = arith.constant 0 : index
    %78 = vector.load %arg7[%c0_73, %c0_74, %c0_75] : memref<3x64x128xf32, #tpu.memory_space<vmem>>, vector<1x64x128xf32>
    %79 = vector.shape_cast %78 : vector<1x64x128xf32> to vector<64x128xf32>
    %cst_76 = arith.constant dense<0.000000e+00> : vector<16x128xf32>
    %80 = tpu.matmul %74, %79, %cst_76 {dimension_numbers = #tpu.dot_dimension_numbers<[1], [0], [0], [1], [0, 0, 1, 1], [], []>} : vector<16x64xf32>, vector<64x128xf32>, vector<16x128xf32> -> vector<16x128xf32>
    %c1_77 = arith.constant 1 : index
    %c0_78 = arith.constant 0 : index
    %c0_79 = arith.constant 0 : index
    %81 = vector.load %arg7[%c1_77, %c0_78, %c0_79] : memref<3x64x128xf32, #tpu.memory_space<vmem>>, vector<1x64x128xf32>
    %82 = vector.shape_cast %81 : vector<1x64x128xf32> to vector<64x128xf32>
    %cst_80 = arith.constant dense<0.000000e+00> : vector<16x128xf32>
    %83 = tpu.matmul %64, %82, %cst_80 {dimension_numbers = #tpu.dot_dimension_numbers<[1], [0], [0], [1], [0, 0, 1, 1], [], []>} : vector<16x64xf32>, vector<64x128xf32>, vector<16x128xf32> -> vector<16x128xf32>
    %84 = arith.addf %80, %83 : vector<16x128xf32>
    %c2_81 = arith.constant 2 : index
    %c0_82 = arith.constant 0 : index
    %c0_83 = arith.constant 0 : index
    %85 = vector.load %arg7[%c2_81, %c0_82, %c0_83] : memref<3x64x128xf32, #tpu.memory_space<vmem>>, vector<1x64x128xf32>
    %86 = vector.shape_cast %85 : vector<1x64x128xf32> to vector<64x128xf32>
    %cst_84 = arith.constant dense<0.000000e+00> : vector<16x128xf32>
    %87 = tpu.matmul %77, %86, %cst_84 {dimension_numbers = #tpu.dot_dimension_numbers<[1], [0], [0], [1], [0, 0, 1, 1], [], []>} : vector<16x64xf32>, vector<64x128xf32>, vector<16x128xf32> -> vector<16x128xf32>
    %88 = arith.addf %84, %87 : vector<16x128xf32>
    %89 = vector.broadcast %67 : vector<1x128xf32> to vector<16x128xf32>
    %90 = arith.addf %88, %89 : vector<16x128xf32>
    %cst_85 = arith.constant 1.000000e+00 : f32
    %91 = vector.broadcast %cst_85 : f32 to vector<1x16xf32>
    %cst_86 = arith.constant dense<0.000000e+00> : vector<1x128xf32>
    %92 = tpu.matmul %91, %90, %cst_86 {dimension_numbers = #tpu.dot_dimension_numbers<[1], [0], [0], [1], [0, 0, 1, 1], [], []>} : vector<1x16xf32>, vector<16x128xf32>, vector<1x128xf32> -> vector<1x128xf32>
    %93 = arith.mulf %90, %90 : vector<16x128xf32>
    %cst_87 = arith.constant dense<0.000000e+00> : vector<1x128xf32>
    %94 = tpu.matmul %91, %93, %cst_87 {dimension_numbers = #tpu.dot_dimension_numbers<[1], [0], [0], [1], [0, 0, 1, 1], [], []>} : vector<1x16xf32>, vector<16x128xf32>, vector<1x128xf32> -> vector<1x128xf32>
    %cst_88 = arith.constant dense<0.000000e+00> : vector<1x128xf32>
    %95 = tpu.matmul %92, %65, %cst_88 {dimension_numbers = #tpu.dot_dimension_numbers<[1], [0], [0], [1], [0, 0, 1, 1], [], []>} : vector<1x128xf32>, vector<128x128xf32>, vector<1x128xf32> -> vector<1x128xf32>
    %cst_89 = arith.constant 7.812500e-03 : f32
    %96 = vector.broadcast %cst_89 : f32 to vector<1x128xf32>
    %97 = arith.mulf %95, %96 : vector<1x128xf32>
    %cst_90 = arith.constant dense<0.000000e+00> : vector<1x128xf32>
    %98 = tpu.matmul %94, %65, %cst_90 {dimension_numbers = #tpu.dot_dimension_numbers<[1], [0], [0], [1], [0, 0, 1, 1], [], []>} : vector<1x128xf32>, vector<128x128xf32>, vector<1x128xf32> -> vector<1x128xf32>
    %cst_91 = arith.constant 7.812500e-03 : f32
    %99 = vector.broadcast %cst_91 : f32 to vector<1x128xf32>
    %100 = arith.mulf %98, %99 : vector<1x128xf32>
    %101 = arith.mulf %97, %97 : vector<1x128xf32>
    %102 = arith.subf %100, %101 : vector<1x128xf32>
    %cst_92 = arith.constant 9.99999974E-6 : f32
    %103 = vector.broadcast %cst_92 : f32 to vector<1x128xf32>
    %104 = arith.addf %102, %103 : vector<1x128xf32>
    %105 = math.rsqrt %104 : vector<1x128xf32>
    %106 = arith.mulf %69, %105 : vector<1x128xf32>
    %107 = arith.mulf %97, %106 : vector<1x128xf32>
    %108 = arith.subf %71, %107 : vector<1x128xf32>
    %109 = vector.broadcast %106 : vector<1x128xf32> to vector<16x128xf32>
    %110 = arith.mulf %90, %109 : vector<16x128xf32>
    %111 = vector.broadcast %108 : vector<1x128xf32> to vector<16x128xf32>
    %112 = arith.addf %110, %111 : vector<16x128xf32>
    %cst_93 = arith.constant 0.000000e+00 : f32
    %113 = vector.broadcast %cst_93 : f32 to vector<16x128xf32>
    %114 = arith.maximumf %112, %113 : vector<16x128xf32>
    %c0_94 = arith.constant 0 : index
    %c0_95 = arith.constant 0 : index
    %115 = vector.load %arg11[%c0_94, %c0_95] : memref<16x128xf32, #tpu.memory_space<vmem>>, vector<16x128xf32>
    tpu.vector_store %arg11[%c0_94, %c0_95], %114 {strides = array<i32>} : memref<16x128xf32, #tpu.memory_space<vmem>>, vector<16x128xf32>,
    return
  }
}

</mosaic_0001>

<bundles_post_ra>
// kernel: tpu_custom_call.1
= control target key start
LH: loop header
LB: loop body
LE: loop exit
PB: predicated region body
PF: predicated region fallthrough
CT: control target
= control target key end

     0   :  { %16 = vsyncpa [#allocation3], 0  ;;  %s3739_s0 = inlined_call_operand.hbm [shape: f32[32,64], index: 0, kind: input, shape index: {}]   ;;  %s3740_s1 = inlined_call_operand.vmem [shape: f32[3,64,128], index: 1, kind: input, shape index: {}]   ;;  %s3741_s2 = inlined_call_operand.hbm [shape: f32[2,32,32], index: 2, kind: input, shape index: {}]   ;;  %s3742_s3 = inlined_call_operand.hbm [shape: f32[128,128], index: 3, kind: input, shape index: {}]   ;;  %s3743_s4 = inlined_call_operand.vmem [shape: f32[3,1,128], index: 4, kind: input, shape index: {}]   ;;  %s3744_s5 = inlined_call_operand.hbm [shape: f32[2,16,32], index: 5, kind: input, shape index: {}]   ;;  %s3745_s6 = inlined_call_operand.vmem [shape: f32[2,128,64], index: 6, kind: input, shape index: {}]   ;;  %s3746_s7 = inlined_call_operand.vmem [shape: f32[3,64,128], index: 7, kind: input, shape index: {}]   ;;  %s3747_s8 = inlined_call_operand.hbm [shape: f32[2,16,16], index: 8, kind: input, shape index: {}]   ;;  %s3748_s9 = inlined_call_operand.hbm [shape: f32[128,128], index: 9, kind: input, shape index: {}]   ;;  %s3749_s10 = inlined_call_operand.vmem [shape: f32[3,1,128], index: 10, kind: input, shape index: {}]   ;;  %s3750_s11 = inlined_call_operand.hbm [shape: f32[16,128], index: 11, kind: output, shape index: {}]  }
   0x1   :  { %17 = vsyncpa [#allocation6], 0 }
   0x2   :  { %18 = vsyncpa [#allocation9], 0 }
   0x3   :  { %19 = vsyncpa [#allocation12], 0 }
   0x4   :  { %20 = vsyncpa [#allocation4], 0  ;;  %s3070_s17 = smov [#allocation5]   ;;  %s3071_s19 = smov [#allocation8]  }
   0x5   :  { %s40_s18 = sshll.u32 %s3070_s17, 4  ;;  %s66_s20 = sshll.u32 %s3071_s19, 4  ;;  %s41_s18 = int_to_ptr.vmem [resolvable:$true] %s40_s18  ;;  %s67_s20 = int_to_ptr.vmem [resolvable:$true] %s66_s20 }
   0x6   :  { %s2928_s21 = scalar_lea.vmem %s41_s18, 1024  ;;  %p2933_p1 = scmp.lt.s32.totalorder %s41_s18, %s41_s18 }
   0x7   :  { %p2929_p0 = scmp.ne.s32.totalorder %s41_s18, %s2928_s21  ;;  %p2934_p2 = scmp.lt.s32.totalorder %s2928_s21, %s2928_s21 }
   0x9   :  { %p2935_p3 = por %p2934_p2, %p2933_p1 }
   0xb   :  { %p2936_p4 = pnand %p2935_p3, %p2929_p0 }
   0xd   :  { %2939 = shalt.err (!%p2936_p4)
}
   0xe   :  { %s3072_s22 = smov 128   ;;  %s3073_s23 = smov 8  }
   0xf   :  { %46 = dma.hbm_to_vmem [thread:$0]  %s3741_s2, 1024, %s41_s18, [#allocation6], %s3072_s22, %s3072_s22, %s3073_s23  }
  0x10   :  { %s2948_s26 = scalar_lea.vmem %s67_s20, 512  ;;  %p2953_p6 = scmp.lt.s32.totalorder %s67_s20, %s67_s20 }
  0x11   :  { %p2949_p5 = scmp.ne.s32.totalorder %s67_s20, %s2948_s26  ;;  %p2954_p7 = scmp.lt.s32.totalorder %s2948_s26, %s2948_s26 }
  0x13   :  { %p2955_p8 = por %p2954_p7, %p2953_p6 }
  0x15   :  { %p2956_p9 = pnand %p2955_p8, %p2949_p5 }
  0x17   :  { %2959 = shalt.err (!%p2956_p9)
}
  0x18   :  { %72 = dma.hbm_to_vmem [thread:$0]  %s3744_s5, 512, %s67_s20, [#allocation9], %s3072_s22, %s3072_s22, %s3073_s23  }
  0x19   :  { %s3074_s29 = smov [#allocation2]   ;;  %s3075_s12 = smov [#allocation7]  }
  0x1a   :  { %s26_s30 = sshll.u32 %s3074_s29, 4  ;;  %s52_s13 = sshll.u32 %s3075_s12, 4  ;;  %s27_s30 = int_to_ptr.vmem [resolvable:$true] %s26_s30  ;;  %s53_s13 = int_to_ptr.vmem [resolvable:$true] %s52_s13 }
  0x1b   :  { %s2968_s2 = scalar_lea.vmem %s27_s30, 512  ;;  %p2973_p11 = scmp.lt.s32.totalorder %s27_s30, %s27_s30 }
  0x1c   :  { %p2969_p10 = scmp.ne.s32.totalorder %s27_s30, %s2968_s2  ;;  %p2974_p12 = scmp.lt.s32.totalorder %s2968_s2, %s2968_s2 }
  0x1e   :  { %p2975_p13 = por %p2974_p12, %p2973_p11 }
  0x20   :  { %p2976_p0 = pnand %p2975_p13, %p2969_p10 }
  0x22   :  { %2979 = shalt.err (!%p2976_p0)
}
  0x23   :  { %32 = dma.hbm_to_vmem [thread:$0]  %s3739_s0, 512, %s27_s30, [#allocation3], %s3072_s22, %s3072_s22, %s3073_s23  }
  0x24   :  { %s2988_s5 = scalar_lea.vmem %s53_s13, 2048  ;;  %p2993_p2 = scmp.lt.s32.totalorder %s53_s13, %s53_s13 }
  0x25   :  { %p2989_p1 = scmp.ne.s32.totalorder %s53_s13, %s2988_s5  ;;  %p2994_p3 = scmp.lt.s32.totalorder %s2988_s5, %s2988_s5 }
  0x27   :  { %p2995_p4 = por %p2994_p3, %p2993_p2 }
  0x29   :  { %p2996_p5 = pnand %p2995_p4, %p2989_p1 }
  0x2b   :  { %2999 = shalt.err (!%p2996_p5)
}
  0x2c   :  { %58 = dma.hbm_to_vmem [thread:$0]  %s3742_s3, 2048, %s53_s13, [#allocation6], %s3072_s22, %s3072_s22, %s3073_s23  }
  0x2d   :  { %s3076_s18 = smov [#allocation10]   ;;  %s3077_s20 = smov [#allocation11]  }
  0x2e   :  { %s82_s19 = sshll.u32 %s3076_s18, 4  ;;  %s94_s21 = sshll.u32 %s3077_s20, 4  ;;  %s83_s19 = int_to_ptr.vmem [resolvable:$true] %s82_s19  ;;  %s95_s21 = int_to_ptr.vmem [resolvable:$true] %s94_s21 }
  0x2f   :  { %s3008_s0 = scalar_lea.vmem %s83_s19, 512  ;;  %p3013_p7 = scmp.lt.s32.totalorder %s83_s19, %s83_s19 }
  0x30   :  { %p3009_p6 = scmp.ne.s32.totalorder %s83_s19, %s3008_s0  ;;  %p3014_p8 = scmp.lt.s32.totalorder %s3008_s0, %s3008_s0 }
  0x32   :  { %p3015_p9 = por %p3014_p8, %p3013_p7 }
  0x34   :  { %p3016_p10 = pnand %p3015_p9, %p3009_p6 }
  0x36   :  { %3019 = shalt.err (!%p3016_p10)
}
  0x37   :  { %88 = dma.hbm_to_vmem [thread:$0]  %s3747_s8, 512, %s83_s19, [#allocation9], %s3072_s22, %s3072_s22, %s3073_s23  }
  0x38   :  { %s3028_s3 = scalar_lea.vmem %s95_s21, 2048  ;;  %p3033_p12 = scmp.lt.s32.totalorder %s95_s21, %s95_s21 }
  0x39   :  { %p3029_p11 = scmp.ne.s32.totalorder %s95_s21, %s3028_s3  ;;  %p3034_p13 = scmp.lt.s32.totalorder %s3028_s3, %s3028_s3 }
  0x3b   :  { %p3035_p0 = por %p3034_p13, %p3033_p12 }
  0x3d   :  { %p3036_p1 = pnand %p3035_p0, %p3029_p11 }
  0x3f   :  { %3039 = shalt.err (!%p3036_p1)
}
  0x40   :  { %100 = dma.hbm_to_vmem [thread:$0]  %s3748_s9, 2048, %s95_s21, [#allocation12], %s3072_s22, %s3072_s22, %s3073_s23  }
  0x41   :  { %3060 = dma.done.wait [#allocation3], 512  }
  0x42   :  { %3061 = vsyncadd [#allocation3], 4294966784 }
  0x43   :  { %3062 = dma.done.wait [#allocation6], 3072  }
  0x44   :  { %3063 = vsyncadd [#allocation6], 4294964224 }
  0x45   :  { %3064 = dma.done.wait [#allocation9], 1024  }
  0x46   :  { %3065 = vsyncadd [#allocation9], 4294966272 }
  0x47   :  { %3066 = dma.done.wait [#allocation12], 2048  }
  0x48   :  { %3067 = vsyncadd [#allocation12], 4294965248  ;;  %v3178_v0 = vld [vmem:[#allocation2 + $0x18] sm:$0xff]  ;;  %v3180_v1 = vld [vmem:[#allocation2 + $0x10] sm:$0xff]  ;;  %vm150_vm0 = vcmask 261120   ;;  %vm367_vm1 = vcmask 523264  }
  0x49   :  { %2471 = vmatprep.subr.mxu0 %v3178_v0  ;;  %2485 = vmatprep.subr.mxu1 %v3178_v0  ;;  %v3186_v2 = vld [vmem:[#allocation2 + $0x8] sm:$0xff]  ;;  %v121_v3 = vld [vmem:[#allocation2] sm:$0xff]  ;;  %v148_v8 = vld [vmem:[#allocation5 + $0x10] sm:$0xff]  ;;  %v3078_v44 = vmov 0.0   ;;  %vm3079_vm2 = vmmov 0   ;;  %vm1379_vm3 = vcmask 130048  }
  0x4a   :  { %2472 = vmatpush3.msra.mxu0 %v3178_v0  ;;  %2486 = vmatpush3.msra.mxu1 %v3178_v0  ;;  %v146_v4 = vld [vmem:[#allocation5] sm:$0xff]  ;;  %v147_v6 = vld [vmem:[#allocation5 + $0x8] sm:$0xff]  ;;  %v251_v9 = vld [vmem:[#allocation5 + $0x30] sm:$0xff]  ;;  %s3081_s26 = smov [#allocation13]  }
  0x4b   :  { %2473 = vmatprep.subr.mxu0 %v3180_v1  ;;  %2487 = vmatprep.subr.mxu1 %v3180_v1  ;;  %v249_v5 = vld [vmem:[#allocation5 + $0x20] sm:$0xff]  ;;  %v250_v7 = vld [vmem:[#allocation5 + $0x28] sm:$0xff]  ;;  %v2174_v10 = vld [vmem:[%s3740_s1 + $0x78] sm:$0xff] }
  0x4c   :  { %2474 = vmatpush3.msra.mxu0 %v3180_v1  ;;  %2488 = vmatpush3.msra.mxu1 %v3180_v1  ;;  %v357_v11 = vld [vmem:[%s3740_s1 + $0x38] sm:$0xff]  ;;  %v2173_v14 = vld [vmem:[%s3740_s1 + $0x70] sm:$0xff]  ;;  %v2172_v16 = vld [vmem:[%s3740_s1 + $0x68] sm:$0xff] }
  0x4d   :  { %2475 = vmatprep.subr.mxu0 %v3186_v2  ;;  %2489 = vmatprep.subr.mxu1 %v3186_v2  ;;  %v149_v12 = vld [vmem:[#allocation5 + $0x18] sm:$0xff]  ;;  %v356_v15 = vld [vmem:[%s3740_s1 + $0x30] sm:$0xff]  ;;  %v355_v17 = vld [vmem:[%s3740_s1 + $0x28] sm:$0xff] }
  0x4e   :  { %2476 = vmatpush3.msra.mxu0 %v3186_v2  ;;  %2490 = vmatpush3.msra.mxu1 %v3186_v2  ;;  %v252_v13 = vld [vmem:[#allocation5 + $0x38] sm:$0xff]  ;;  %v2171_v18 = vld [vmem:[%s3740_s1 + $0x60] sm:$0xff]  ;;  %v2169_v22 = vld [vmem:[%s3740_s1 + $0x50] sm:$0xff] }
  0x4f   :  { %2477 = vmatprep.subr.mxu0 %v121_v3  ;;  %2491 = vmatprep.subr.mxu1 %v121_v3  ;;  %v354_v19 = vld [vmem:[%s3740_s1 + $0x20] sm:$0xff]  ;;  %v2170_v20 = vld [vmem:[%s3740_s1 + $0x58] sm:$0xff]  ;;  %v352_v23 = vld [vmem:[%s3740_s1 + $0x10] sm:$0xff] }
  0x50   :  { %2478 = vmatpush3.msra.mxu0 %v121_v3  ;;  %2479 = vmatprep.mubr.msk.f32.mxu0 %vm150_vm0, %v146_v4  ;;  %v353_v21 = vld [vmem:[%s3740_s1 + $0x18] sm:$0xff]  ;;  %v2168_v24 = vld [vmem:[%s3740_s1 + $0x48] sm:$0xff]  ;;  %v2167_v25 = vld [vmem:[%s3740_s1 + $0x40] sm:$0xff] }
  0x51   :  { %2492 = vmatpush3.msra.mxu1 %v121_v3  ;;  %2493 = vmatprep.mubr.msk.f32.mxu1 %vm150_vm0, %v249_v5  ;;  %v2190_v26 = vld [vmem:[%s3740_s1 + $0xb8] sm:$0xff]  ;;  %v2189_v27 = vld [vmem:[%s3740_s1 + $0xb0] sm:$0xff]  ;;  %v2188_v28 = vld [vmem:[%s3740_s1 + $0xa8] sm:$0xff] }
  0x52   :  { %2480 = vmatmul.mubr.msk.f32.vlgmr.msra.gmra.mxu0 %vm150_vm0, %v147_v6  ;;  %2494 = vmatmul.mubr.msk.f32.vlgmr.msra.gmra.mxu1 %vm150_vm0, %v250_v7  ;;  %v2187_v29 = vld [vmem:[%s3740_s1 + $0xa0] sm:$0xff]  ;;  %v2186_v30 = vld [vmem:[%s3740_s1 + $0x98] sm:$0xff]  ;;  %v2185_v31 = vld [vmem:[%s3740_s1 + $0x90] sm:$0xff] }
  0x53   :  { %2482 = vmatprep.mubr.msk.f32.mxu0 %vm150_vm0, %v148_v8  ;;  %2496 = vmatprep.mubr.msk.f32.mxu1 %vm150_vm0, %v251_v9  ;;  %v351_v32 = vld [vmem:[%s3740_s1 + $0x8] sm:$0xff]  ;;  %v350_v34 = vld [vmem:[%s3740_s1] sm:$0xff]  ;;  %v3297_v45 = vld [vmem:[#allocation7 + $0x78] sm:$0xff] }
  0x54   :  { %2499 = vmatprep.subr.mxu0 %v2174_v10  ;;  %2521 = vmatprep.subr.mxu1 %v357_v11  ;;  %v2184_v33 = vld [vmem:[%s3740_s1 + $0x88] sm:$0xff]  ;;  %v2183_v35 = vld [vmem:[%s3740_s1 + $0x80] sm:$0xff]  ;;  %v3299_v46 = vld [vmem:[#allocation7 + $0x70] sm:$0xff] }
  0x55   :  { %2500 = vmatpush3.msra.mxu0 %v2174_v10  ;;  %2522 = vmatpush3.msra.mxu1 %v357_v11  ;;  %v3303_v47 = vld [vmem:[#allocation7 + $0x68] sm:$0xff]  ;;  %v3307_v48 = vld [vmem:[#allocation7 + $0x60] sm:$0xff]  ;;  %v3311_v49 = vld [vmem:[#allocation7 + $0x58] sm:$0xff] }
  0x56   :  { %2483 = vmatmul.mubr.msk.f32.gmra.mxu0 %vm150_vm0, %v149_v12  ;;  %2497 = vmatmul.mubr.msk.f32.gmra.mxu1 %vm150_vm0, %v252_v13  ;;  %v3315_v50 = vld [vmem:[#allocation7 + $0x50] sm:$0xff]  ;;  %v3319_v51 = vld [vmem:[#allocation7 + $0x48] sm:$0xff]  ;;  %v3323_v52 = vld [vmem:[#allocation7 + $0x40] sm:$0xff] }
  0x57   :  { %2501 = vmatprep.subr.mxu0 %v2173_v14  ;;  %2515 = vmatprep.mubr.msk.f32.mxu0 %vm367_vm1, %v121_v3  ;;  %v3327_v53 = vld [vmem:[#allocation7 + $0x38] sm:$0xff]  ;;  %v3331_v54 = vld [vmem:[#allocation7 + $0x30] sm:$0xff]  ;;  %v3335_v55 = vld [vmem:[#allocation7 + $0x28] sm:$0xff] }
  0x58   :  { %2502 = vmatpush3.msra.mxu0 %v2173_v14  ;;  %2523 = vmatprep.subr.mxu1 %v356_v15  ;;  %v3339_v56 = vld [vmem:[#allocation7 + $0x20] sm:$0xff]  ;;  %v3343_v57 = vld [vmem:[#allocation7 + $0x18] sm:$0xff]  ;;  %v3347_v58 = vld [vmem:[#allocation7 + $0x10] sm:$0xff] }
  0x59   :  { %2503 = vmatprep.subr.mxu0 %v2172_v16  ;;  %2524 = vmatpush3.msra.mxu1 %v356_v15  ;;  %v3351_v59 = vld [vmem:[#allocation7 + $0x8] sm:$0xff]  ;;  %v2195_v12 = vld [vmem:[%s3743_s4] ss:$0 sm:$0xff] }
  0x5a   :  { %2504 = vmatpush3.msra.mxu0 %v2172_v16  ;;  %2525 = vmatprep.subr.mxu1 %v355_v17 }
  0x5b   :  { %2505 = vmatprep.subr.mxu0 %v2171_v18  ;;  %2526 = vmatpush3.msra.mxu1 %v355_v17 }
  0x5c   :  { %2506 = vmatpush3.msra.mxu0 %v2171_v18  ;;  %2527 = vmatprep.subr.mxu1 %v354_v19 }
  0x5d   :  { %2507 = vmatprep.subr.mxu0 %v2170_v20  ;;  %2528 = vmatpush3.msra.mxu1 %v354_v19 }
  0x5e   :  { %2508 = vmatpush3.msra.mxu0 %v2170_v20  ;;  %2529 = vmatprep.subr.mxu1 %v353_v21 }
  0x5f   :  { %2509 = vmatprep.subr.mxu0 %v2169_v22  ;;  %2530 = vmatpush3.msra.mxu1 %v353_v21 }
  0x60   :  { %2510 = vmatpush3.msra.mxu0 %v2169_v22  ;;  %2531 = vmatprep.subr.mxu1 %v352_v23  ;;  %v3080_v22 = vmov 1.0  }
  0x61   :  { %2511 = vmatprep.subr.mxu0 %v2168_v24  ;;  %2532 = vmatpush3.msra.mxu1 %v352_v23 }
  0x62   :  { %2512 = vmatpush3.msra.mxu0 %v2168_v24  ;;  %2533 = vmatprep.subr.mxu1 %v351_v32 }
  0x63   :  { %2513 = vmatprep.subr.mxu0 %v2167_v25  ;;  %2534 = vmatpush3.msra.mxu1 %v351_v32  ;;  %v1086_v32 = vld [vmem:[#allocation8 + $0x10] sm:$0xff] }
  0x64   :  { %2514 = vmatpush3.msra.mxu0 %v2167_v25  ;;  %2535 = vmatprep.subr.mxu1 %v350_v34 }
  0x65   :  { %2543 = vmatprep.subr.mxu0 %v2190_v26  ;;  %2516 = vmatmul.mubr.msk.f32.vlgmr.msra.gmra.mxu0 %vm367_vm1, %v3186_v2 }
  0x66   :  { %2544 = vmatpush3.msra.mxu0 %v2190_v26  ;;  %2518 = vmatprep.mubr.msk.f32.mxu0 %vm367_vm1, %v3180_v1  ;;  %v125_v26 = vld [vmem:[#allocation7] sm:$0xff] }
  0x67   :  { %2545 = vmatprep.subr.mxu0 %v2189_v27  ;;  %2536 = vmatpush3.msra.mxu1 %v350_v34 }
  0x68   :  { %2546 = vmatpush3.msra.mxu0 %v2189_v27  ;;  %2565 = vmatprep.subr.mxu1 %v3078_v44 }
  0x69   :  { %2547 = vmatprep.subr.mxu0 %v2188_v28  ;;  %2519 = vmatmul.mubr.msk.f32.gmra.mxu0 %vm367_vm1, %v3178_v0 }
  0x6a   :  { %2548 = vmatpush3.msra.mxu0 %v2188_v28 }
  0x6b   :  { %2549 = vmatprep.subr.mxu0 %v2187_v29 }
  0x6c   :  { %2550 = vmatpush3.msra.mxu0 %v2187_v29 }
  0x6d   :  { %2551 = vmatprep.subr.mxu0 %v2186_v30 }
  0x6e   :  { %2552 = vmatpush3.msra.mxu0 %v2186_v30 }
  0x6f   :  { %2553 = vmatprep.subr.mxu0 %v2185_v31 }
  0x70   :  { %2554 = vmatpush3.msra.mxu0 %v2185_v31  ;;  %v1002_v31 = vld [vmem:[#allocation8] sm:$0xff] }
  0x71   :  { %2555 = vmatprep.subr.mxu0 %v2184_v33 }
  0x72   :  { %2556 = vmatpush3.msra.mxu0 %v2184_v33 }
  0x73   :  { %2557 = vmatprep.subr.mxu0 %v2183_v35 }
  0x74   :  { %2558 = vmatpush3.msra.mxu0 %v2183_v35 }
  0x75   :  { %2587 = vmatprep.subr.mxu0 %v3078_v44 }
 0x112   :  { %v2481_v36 = vpop.f32.mrf.mxu0  ;;  %v2495_v37 = vpop.f32.mrf.mxu1 }
 0x114   :  { %v229_v38 = vpop.f32.mrf.mxu0  ;;  %v331_v39 = vpop.f32.mrf.mxu1 }
 0x115   :  { %2537 = vmatprep.mubr.msk.f32.mxu1 %vm367_vm1, %v229_v38  ;;  %2559 = vmatprep.mubr.msk.f32.mxu0 %vm367_vm1, %v331_v39 }
 0x116   :  { %v2484_v40 = vpop.f32.mrf.mxu0  ;;  %v2498_v41 = vpop.f32.mrf.mxu1  ;;  %2538 = vmatmul.mubr.msk.f32.vlgmr.msra.gmra.mxu1 %vm367_vm1, %v2481_v36  ;;  %2560 = vmatmul.mubr.msk.f32.vlgmr.msra.gmra.mxu0 %vm367_vm1, %v2495_v37 }
 0x117   :  { %2588 = vmatpush3.msra.mxu0 %v3297_v45 }
 0x118   :  { %v239_v42 = vpop.f32.mrf.mxu0  ;;  %v341_v43 = vpop.f32.mrf.mxu1  ;;  %2589 = vmatprep.subr.mxu0 %v3078_v44 }
 0x119   :  { %2540 = vmatprep.mubr.msk.f32.mxu1 %vm367_vm1, %v239_v42  ;;  %2562 = vmatprep.mubr.msk.f32.mxu0 %vm367_vm1, %v341_v43  ;;  %v979_v42 = vlaneseq }
 0x11a   :  { %2541 = vmatmul.mubr.msk.f32.gmra.mxu1 %vm367_vm1, %v2484_v40  ;;  %2563 = vmatmul.mubr.msk.f32.gmra.mxu0 %vm367_vm1, %v2498_v41 }
 0x11b   :  { %2573 = vmatprep.mubr.msk.f32.mxu1 %vm3079_vm2, %v3078_v44  ;;  %2619 = vmatprep.mubr.msk.f32.mxu0 %vm3079_vm2, %v3078_v44  ;;  %v980_v43 = vshrl.u32 %v979_v42, 7 }
 0x11c   :  { %2590 = vmatpush3.msra.mxu0 %v3299_v46 }
 0x11d   :  { %2591 = vmatprep.subr.mxu0 %v3078_v44 }
 0x11e   :  { %2592 = vmatpush3.msra.mxu0 %v3303_v47 }
 0x11f   :  { %2593 = vmatprep.subr.mxu0 %v3078_v44 }
 0x120   :  { %2594 = vmatpush3.msra.mxu0 %v3307_v48 }
 0x121   :  { %2595 = vmatprep.subr.mxu0 %v3078_v44 }
 0x122   :  { %2596 = vmatpush3.msra.mxu0 %v3311_v49 }
 0x123   :  { %2597 = vmatprep.subr.mxu0 %v3078_v44 }
 0x124   :  { %2598 = vmatpush3.msra.mxu0 %v3315_v50 }
 0x125   :  { %2599 = vmatprep.subr.mxu0 %v3078_v44  ;;  %v2517_v60 = vpop.f32.mrf.mxu0 }
 0x126   :  { %2600 = vmatpush3.msra.mxu0 %v3319_v51 }
 0x127   :  { %2601 = vmatprep.subr.mxu0 %v3078_v44  ;;  %v446_v61 = vpop.f32.mrf.mxu0 }
 0x128   :  { %2602 = vmatpush3.msra.mxu0 %v3323_v52 }
 0x129   :  { %2603 = vmatprep.subr.mxu0 %v3078_v44  ;;  %v2520_v62 = vpop.f32.mrf.mxu0 }
 0x12a   :  { %2604 = vmatpush3.msra.mxu0 %v3327_v53 }
 0x12b   :  { %2605 = vmatprep.subr.mxu0 %v3078_v44  ;;  %v456_v63 = vpop.f32.mrf.mxu0 }
 0x12c   :  { %2606 = vmatpush3.msra.mxu0 %v3331_v54 }
 0x12d   :  { %2607 = vmatprep.subr.mxu0 %v3078_v44 }
 0x12e   :  { %2608 = vmatpush3.msra.mxu0 %v3335_v55 }
 0x12f   :  { %2609 = vmatprep.subr.mxu0 %v3078_v44 }
 0x130   :  { %2610 = vmatpush3.msra.mxu0 %v3339_v56 }
 0x131   :  { %2611 = vmatprep.subr.mxu0 %v3078_v44 }
 0x132   :  { %2612 = vmatpush3.msra.mxu0 %v3343_v57 }
 0x133   :  { %2613 = vmatprep.subr.mxu0 %v3078_v44 }
 0x134   :  { %2614 = vmatpush3.msra.mxu0 %v3347_v58 }
 0x135   :  { %2615 = vmatprep.subr.mxu0 %v3078_v44 }
 0x136   :  { %2616 = vmatpush3.msra.mxu0 %v3351_v59 }
 0x137   :  { %2617 = vmatprep.subr.mxu0 %v3078_v44 }
 0x138   :  { %2618 = vmatpush3.msra.mxu0 %v125_v26 }
 0x1d6   :  { %v2539_v0 = vpop.f32.mrf.mxu1  ;;  %v2561_v1 = vpop.f32.mrf.mxu0 }
 0x1d7   :  { %v549_v6 = vadd.f32 %v2539_v0, %v2517_v60 }
 0x1d8   :  { %v543_v2 = vpop.f32.mrf.mxu1  ;;  %v649_v3 = vpop.f32.mrf.mxu0 }
 0x1d9   :  { %v544_v9 = vadd.f32 %v543_v2, %v446_v61  ;;  %v669_v14 = vadd.f32 %v2561_v1, %v549_v6  ;;  %v1003_v2 = vld [vmem:[#allocation8 + $0x8] sm:$0xff]  ;;  %v1185_v6 = vld [vmem:[%s3745_s6 + $0x70] sm:$0xff] }
 0x1da   :  { %v2542_v4 = vpop.f32.mrf.mxu1  ;;  %v2564_v5 = vpop.f32.mrf.mxu0 }
 0x1db   :  { %v559_v7 = vadd.f32 %v2542_v4, %v2520_v62  ;;  %v668_v17 = vadd.f32 %v649_v3, %v544_v9  ;;  %v3366_v19 = vadd.f32 %v2195_v12, %v669_v14  ;;  %v1087_v3 = vld [vmem:[#allocation8 + $0x18] sm:$0xff]  ;;  %v2215_v9 = vld [vmem:[%s3745_s6 + $0xe8] sm:$0xff]  ;;  %v1181_v14 = vld [vmem:[%s3745_s6 + $0x50] sm:$0xff] }
 0x1dc   :  { %v553_v8 = vpop.f32.mrf.mxu1  ;;  %v659_v13 = vpop.f32.mrf.mxu0  ;;  %v1186_v4 = vld [vmem:[%s3745_s6 + $0x78] sm:$0xff] }
 0x1dd   :  { %v671_v10 = vadd.f32 %v2564_v5, %v559_v7  ;;  %v554_v11 = vadd.f32 %v553_v8, %v456_v63  ;;  %v3370_v20 = vadd.f32 %v2195_v12, %v668_v17  ;;  %v756_v24 = vmul.f32 %v3366_v19, %v3366_v19  ;;  %v2217_v5 = vld [vmem:[%s3745_s6 + $0xf8] sm:$0xff]  ;;  %v2216_v7 = vld [vmem:[%s3745_s6 + $0xf0] sm:$0xff]  ;;  %v1184_v8 = vld [vmem:[%s3745_s6 + $0x68] sm:$0xff] }
 0x1de   :  { %v2211_v17 = vld [vmem:[%s3745_s6 + $0xc8] sm:$0xff] }
 0x1df   :  { %v3360_v15 = vadd.f32 %v2195_v12, %v671_v10  ;;  %v670_v16 = vadd.f32 %v659_v13, %v554_v11  ;;  %v755_v25 = vmul.f32 %v3370_v20, %v3370_v20  ;;  %v1183_v10 = vld [vmem:[%s3745_s6 + $0x60] sm:$0xff]  ;;  %v2213_v13 = vld [vmem:[%s3745_s6 + $0xd8] sm:$0xff] }
 0x1e0   :  { %v2214_v11 = vld [vmem:[%s3745_s6 + $0xe0] sm:$0xff] }
 0x1e1   :  { %v3362_v18 = vadd.f32 %v2195_v12, %v670_v16  ;;  %2566 = vmatpush3.msra.mxu1 %v3360_v15  ;;  %v758_v21 = vmul.f32 %v3360_v15, %v3360_v15  ;;  %v1182_v12 = vld [vmem:[%s3745_s6 + $0x58] sm:$0xff]  ;;  %v1180_v16 = vld [vmem:[%s3745_s6 + $0x48] sm:$0xff] }
 0x1e2   :  { %2567 = vmatprep.subr.mxu1 %v3078_v44 }
 0x1e3   :  { %2568 = vmatpush3.msra.mxu1 %v3362_v18  ;;  %v757_v23 = vmul.f32 %v3362_v18, %v3362_v18 }
 0x1e4   :  { %2569 = vmatprep.subr.mxu1 %v3078_v44 }
 0x1e5   :  { %2570 = vmatpush3.msra.mxu1 %v3366_v19 }
 0x1e6   :  { %2571 = vmatprep.subr.mxu1 %v3078_v44 }
 0x1e7   :  { %2572 = vmatpush3.msra.mxu1 %v3370_v20 }
 0x1e8   :  { %2574 = vmatmul.mubr.msk.f32.vlgmr.msra.gmra.mxu1 %vm150_vm0, %v3080_v22  ;;  %2576 = vmatprep.subr.mxu1 %v3078_v44 }
 0x1e9   :  { %2577 = vmatpush3.msra.mxu1 %v758_v21  ;;  %2584 = vmatprep.mubr.msk.f32.mxu1 %vm3079_vm2, %v3078_v44  ;;  %v2209_v21 = vld [vmem:[%s3745_s6 + $0xb8] sm:$0xff] }
 0x1ea   :  { %2578 = vmatprep.subr.mxu1 %v3078_v44 }
 0x1eb   :  { %2579 = vmatpush3.msra.mxu1 %v757_v23  ;;  %v1177_v23 = vld [vmem:[%s3745_s6 + $0x30] sm:$0xff] }
 0x1ec   :  { %2580 = vmatprep.subr.mxu1 %v3078_v44 }
 0x1ed   :  { %2581 = vmatpush3.msra.mxu1 %v756_v24  ;;  %v2208_v24 = vld [vmem:[%s3745_s6 + $0xb0] sm:$0xff] }
 0x1ee   :  { %2582 = vmatprep.subr.mxu1 %v3078_v44 }
 0x1ef   :  { %2583 = vmatpush3.msra.mxu1 %v755_v25  ;;  %v1176_v25 = vld [vmem:[%s3745_s6 + $0x28] sm:$0xff] }
 0x1f0   :  { %2585 = vmatmul.mubr.msk.f32.vlgmr.msra.gmra.mxu1 %vm150_vm0, %v3080_v22  ;;  %2622 = vmatprep.subr.mxu1 %v3078_v44 }
 0x1f1   :  { %2623 = vmatpush3.msra.mxu1 %v3297_v45  ;;  %2654 = vmatprep.mubr.msk.f32.mxu1 %vm3079_vm2, %v3078_v44  ;;  %v2157_v45 = vld [vmem:[%s3743_s4 + $0x1] sm:$0x1] }
 0x1f2   :  { %2624 = vmatprep.subr.mxu1 %v3078_v44 }
 0x1f3   :  { %2625 = vmatpush3.msra.mxu1 %v3299_v46  ;;  %v3431_v46 = vsub.s32 0, %v980_v43 }
 0x1f4   :  { %2626 = vmatprep.subr.mxu1 %v3078_v44 }
 0x1f5   :  { %2627 = vmatpush3.msra.mxu1 %v3303_v47 }
 0x1f6   :  { %2628 = vmatprep.subr.mxu1 %v3078_v44 }
 0x1f7   :  { %2629 = vmatpush3.msra.mxu1 %v3307_v48 }
 0x1f8   :  { %2630 = vmatprep.subr.mxu1 %v3078_v44 }
 0x1f9   :  { %2631 = vmatpush3.msra.mxu1 %v3311_v49  ;;  %v2158_v49 = vld [vmem:[%s3743_s4 + $0x2] sm:$0x1] }
 0x1fa   :  { %2632 = vmatprep.subr.mxu1 %v3078_v44 }
 0x1fb   :  { %2633 = vmatpush3.msra.mxu1 %v3315_v50 }
 0x1fc   :  { %2634 = vmatprep.subr.mxu1 %v3078_v44 }
 0x1fd   :  { %2635 = vmatpush3.msra.mxu1 %v3319_v51 }
 0x1fe   :  { %2636 = vmatprep.subr.mxu1 %v3078_v44 }
 0x1ff   :  { %2637 = vmatpush3.msra.mxu1 %v3323_v52 }
 0x200   :  { %2638 = vmatprep.subr.mxu1 %v3078_v44 }
 0x201   :  { %2639 = vmatpush3.msra.mxu1 %v3327_v53 }
 0x202   :  { %2640 = vmatprep.subr.mxu1 %v3078_v44 }
 0x203   :  { %2641 = vmatpush3.msra.mxu1 %v3331_v54 }
 0x204   :  { %2642 = vmatprep.subr.mxu1 %v3078_v44 }
 0x205   :  { %2643 = vmatpush3.msra.mxu1 %v3335_v55 }
 0x206   :  { %2644 = vmatprep.subr.mxu1 %v3078_v44 }
 0x207   :  { %2645 = vmatpush3.msra.mxu1 %v3339_v56 }
 0x208   :  { %2646 = vmatprep.subr.mxu1 %v3078_v44 }
 0x209   :  { %2647 = vmatpush3.msra.mxu1 %v3343_v57 }
 0x20a   :  { %2648 = vmatprep.subr.mxu1 %v3078_v44 }
 0x20b   :  { %2649 = vmatpush3.msra.mxu1 %v3347_v58 }
 0x20c   :  { %2650 = vmatprep.subr.mxu1 %v3078_v44 }
 0x20d   :  { %2651 = vmatpush3.msra.mxu1 %v3351_v59 }
 0x20e   :  { %2652 = vmatprep.subr.mxu1 %v3078_v44 }
 0x20f   :  { %2653 = vmatpush3.msra.mxu1 %v125_v26  ;;  %v2207_v26 = vld [vmem:[%s3745_s6 + $0xa8] sm:$0xff] }
 0x2a8   :  { %v751_v27 = vpop.f32.mrf.mxu1 }
 0x2a9   :  { %2620 = vmatmul.mubr.f32.vlgmr.msra.gmra.mxu0 %v751_v27  ;;  %v1175_v27 = vld [vmem:[%s3745_s6 + $0x20] sm:$0xff] }
 0x2aa   :  { %v2575_v28 = vpop.f32.mrf.mxu1  ;;  %2665 = vmatprep.mubr.msk.f32.mxu0 %vm150_vm0, %v1002_v31  ;;  %v1173_v31 = vld [vmem:[%s3745_s6 + $0x10] sm:$0xff] }
 0x2ab   :  { %v2206_v28 = vld [vmem:[%s3745_s6 + $0xa0] sm:$0xff] }
 0x2b0   :  { %v825_v29 = vpop.f32.mrf.mxu1 }
 0x2b1   :  { %2655 = vmatmul.mubr.f32.vlgmr.msra.gmra.mxu1 %v825_v29  ;;  %v1174_v29 = vld [vmem:[%s3745_s6 + $0x18] sm:$0xff] }
 0x2b2   :  { %v2586_v30 = vpop.f32.mrf.mxu1  ;;  %2676 = vmatprep.mubr.msk.f32.mxu1 %vm150_vm0, %v1086_v32  ;;  %v2204_v32 = vld [vmem:[%s3745_s6 + $0x90] sm:$0xff] }
 0x2b3   :  { %v2205_v30 = vld [vmem:[%s3745_s6 + $0x98] sm:$0xff] }
 0x369   :  { %v895_v33 = vpop.f32.mrf.mxu0 }
 0x36a   :  { %v899_v35 = vmul.f32 0.001953125, %v895_v33  ;;  %v1172_v33 = vld [vmem:[%s3745_s6 + $0x8] sm:$0xff] }
 0x36b   :  { %v2621_v34 = vpop.f32.mrf.mxu0 }
 0x36c   :  { %v971_v37 = vmul.f32 %v899_v35, %v899_v35  ;;  %v2203_v34 = vld [vmem:[%s3745_s6 + $0x88] sm:$0xff] }
 0x371   :  { %v966_v36 = vpop.f32.mrf.mxu1 }
 0x372   :  { %v970_v38 = vmul.f32 0.001953125, %v966_v36  ;;  %v2202_v36 = vld [vmem:[%s3745_s6 + $0x80] sm:$0xff] }
 0x373   :  { %v2656_v39 = vpop.f32.mrf.mxu1 }
 0x374   :  { %v972_v40 = vsub.f32 %v970_v38, %v971_v37  ;;  %v2231_v37 = vld [vmem:[%s3746_s7 + $0x78] sm:$0xff] }
 0x376   :  { %v973_v41 = vadd.f32 1e-05, %v972_v40 }
 0x378   :  { %2916 = vrsqrt.f32 %v973_v41 }
 0x385   :  { %v2917_v47 = vpop.eup %2916 }
 0x386   :  { %v975_v48 = vmul.f32 %v2917_v47, %v2157_v45  ;;  %v2230_v45 = vld [vmem:[%s3746_s7 + $0x70] sm:$0xff]  ;;  %v2229_v47 = vld [vmem:[%s3746_s7 + $0x68] sm:$0xff] }
 0x388   :  { %v976_v50 = vmul.f32 %v975_v48, %v899_v35  ;;  %v982_v51 = vrot.slane %v975_v48, %v3431_v46  ;;  %v1171_v35 = vld [vmem:[%s3745_s6] sm:$0xff] }
 0x389   :  { %v2228_v48 = vld [vmem:[%s3746_s7 + $0x60] sm:$0xff] }
 0x38a   :  { %v977_v52 = vsub.f32 %v2158_v49, %v976_v50  ;;  %v987_v53 = vmul.f32 %v982_v51, %v3360_v15  ;;  %v986_v55 = vmul.f32 %v982_v51, %v3362_v18  ;;  %v985_v58 = vmul.f32 %v982_v51, %v3366_v19  ;;  %v2212_v15 = vld [vmem:[%s3745_s6 + $0xd0] sm:$0xff]  ;;  %v1179_v18 = vld [vmem:[%s3745_s6 + $0x40] sm:$0xff]  ;;  %v2227_v49 = vld [vmem:[%s3746_s7 + $0x58] sm:$0xff] }
 0x38b   :  { %v984_v61 = vmul.f32 %v982_v51, %v3370_v20  ;;  %v2210_v19 = vld [vmem:[%s3745_s6 + $0xc0] sm:$0xff]  ;;  %v1178_v20 = vld [vmem:[%s3745_s6 + $0x38] sm:$0xff]  ;;  %v2226_v50 = vld [vmem:[%s3746_s7 + $0x50] sm:$0xff]  ;;  %s2142_s6 = sshll.u32 %s3081_s26, 4  ;;  %s2143_s6 = int_to_ptr.vmem [resolvable:$true] %s2142_s6 }
 0x38c   :  { %v992_v54 = vrot.slane %v977_v52, %v3431_v46  ;;  %v2225_v51 = vld [vmem:[%s3746_s7 + $0x48] sm:$0xff]  ;;  %v2224_v52 = vld [vmem:[%s3746_s7 + $0x40] sm:$0xff]  ;;  %p3045_p3 = scmp.lt.s32.totalorder %s2143_s6, %s2143_s6 }
 0x38e   :  { %v997_v56 = vadd.f32 %v992_v54, %v987_v53  ;;  %v996_v57 = vadd.f32 %v992_v54, %v986_v55  ;;  %v995_v60 = vadd.f32 %v992_v54, %v985_v58  ;;  %v994_v63 = vadd.f32 %v992_v54, %v984_v61  ;;  %v1377_v53 = vld [vmem:[#allocation10] sm:$0xff]  ;;  %v2243_v54 = vld [vmem:[%s3746_s7 + $0xb8] sm:$0xff]  ;;  %v1378_v61 = vld [vmem:[#allocation10 + $0x8] sm:$0xff] }
 0x390   :  { %v1001_v59 = vmax.f32 %v997_v56, 0.0  ;;  %v1000_v62 = vmax.f32 %v996_v57, 0.0  ;;  %v999_v0 = vmax.f32 %v995_v60, 0.0  ;;  %v998_v1 = vmax.f32 %v994_v63, 0.0  ;;  %v2242_v63 = vld [vmem:[%s3746_s7 + $0xb0] sm:$0xff] }
 0x392   :  { %2657 = vmatprep.subr.mxu0 %v1001_v59  ;;  %2668 = vmatprep.subr.mxu1 %v1001_v59 }
 0x393   :  { %2658 = vmatpush3.msra.mxu0 %v1001_v59  ;;  %2669 = vmatpush3.msra.mxu1 %v1001_v59 }
 0x394   :  { %2659 = vmatprep.subr.mxu0 %v1000_v62  ;;  %2670 = vmatprep.subr.mxu1 %v1000_v62 }
 0x395   :  { %2660 = vmatpush3.msra.mxu0 %v1000_v62  ;;  %2671 = vmatpush3.msra.mxu1 %v1000_v62  ;;  %v1462_v62 = vld [vmem:[#allocation10 + $0x10] sm:$0xff] }
 0x396   :  { %2661 = vmatprep.subr.mxu0 %v999_v0  ;;  %2672 = vmatprep.subr.mxu1 %v999_v0 }
 0x397   :  { %2662 = vmatpush3.msra.mxu0 %v999_v0  ;;  %2673 = vmatpush3.msra.mxu1 %v999_v0  ;;  %v1463_v0 = vld [vmem:[#allocation10 + $0x18] sm:$0xff] }
 0x398   :  { %2663 = vmatprep.subr.mxu0 %v998_v1  ;;  %2674 = vmatprep.subr.mxu1 %v998_v1 }
 0x399   :  { %2664 = vmatpush3.msra.mxu0 %v998_v1  ;;  %2675 = vmatpush3.msra.mxu1 %v998_v1  ;;  %v1552_v1 = vld [vmem:[%s3746_s7 + $0x38] sm:$0xff] }
 0x39a   :  { %2666 = vmatmul.mubr.msk.f32.vlgmr.msra.gmra.mxu0 %vm150_vm0, %v1003_v2  ;;  %2677 = vmatmul.mubr.msk.f32.vlgmr.msra.gmra.mxu1 %vm150_vm0, %v1087_v3  ;;  %v1551_v2 = vld [vmem:[%s3746_s7 + $0x30] sm:$0xff]  ;;  %v2241_v3 = vld [vmem:[%s3746_s7 + $0xa8] sm:$0xff] }
 0x39b   :  { %2679 = vmatprep.subr.mxu0 %v1186_v4  ;;  %2714 = vmatprep.subr.mxu1 %v2217_v5 }
 0x39c   :  { %2680 = vmatpush3.msra.mxu0 %v1186_v4  ;;  %2715 = vmatpush3.msra.mxu1 %v2217_v5  ;;  %v1550_v4 = vld [vmem:[%s3746_s7 + $0x28] sm:$0xff]  ;;  %v2240_v5 = vld [vmem:[%s3746_s7 + $0xa0] sm:$0xff] }
 0x39d   :  { %2681 = vmatprep.subr.mxu0 %v1185_v6  ;;  %2716 = vmatprep.subr.mxu1 %v2216_v7 }
 0x39e   :  { %2682 = vmatpush3.msra.mxu0 %v1185_v6  ;;  %2717 = vmatpush3.msra.mxu1 %v2216_v7  ;;  %v1549_v6 = vld [vmem:[%s3746_s7 + $0x20] sm:$0xff]  ;;  %v1548_v7 = vld [vmem:[%s3746_s7 + $0x18] sm:$0xff] }
 0x39f   :  { %2683 = vmatprep.subr.mxu0 %v1184_v8  ;;  %2718 = vmatprep.subr.mxu1 %v2215_v9 }
 0x3a0   :  { %2684 = vmatpush3.msra.mxu0 %v1184_v8  ;;  %2719 = vmatpush3.msra.mxu1 %v2215_v9  ;;  %v1547_v8 = vld [vmem:[%s3746_s7 + $0x10] sm:$0xff]  ;;  %v1546_v9 = vld [vmem:[%s3746_s7 + $0x8] sm:$0xff] }
 0x3a1   :  { %2685 = vmatprep.subr.mxu0 %v1183_v10  ;;  %2720 = vmatprep.subr.mxu1 %v2214_v11 }
 0x3a2   :  { %2686 = vmatpush3.msra.mxu0 %v1183_v10  ;;  %2721 = vmatpush3.msra.mxu1 %v2214_v11  ;;  %v2239_v10 = vld [vmem:[%s3746_s7 + $0x98] sm:$0xff]  ;;  %v1545_v11 = vld [vmem:[%s3746_s7] sm:$0xff] }
 0x3a3   :  { %2687 = vmatprep.subr.mxu0 %v1182_v12  ;;  %2722 = vmatprep.subr.mxu1 %v2213_v13 }
 0x3a4   :  { %2688 = vmatpush3.msra.mxu0 %v1182_v12  ;;  %2723 = vmatpush3.msra.mxu1 %v2213_v13  ;;  %v2238_v12 = vld [vmem:[%s3746_s7 + $0x90] sm:$0xff]  ;;  %v2237_v13 = vld [vmem:[%s3746_s7 + $0x88] sm:$0xff] }
 0x3a5   :  { %2689 = vmatprep.subr.mxu0 %v1181_v14  ;;  %2724 = vmatprep.subr.mxu1 %v2212_v15 }
 0x3a6   :  { %2690 = vmatpush3.msra.mxu0 %v1181_v14  ;;  %2725 = vmatpush3.msra.mxu1 %v2212_v15  ;;  %v2236_v14 = vld [vmem:[%s3746_s7 + $0x80] sm:$0xff] }
 0x3a7   :  { %2691 = vmatprep.subr.mxu0 %v1180_v16  ;;  %2726 = vmatprep.subr.mxu1 %v2211_v17 }
 0x3a8   :  { %2692 = vmatpush3.msra.mxu0 %v1180_v16  ;;  %2727 = vmatpush3.msra.mxu1 %v2211_v17 }
 0x3a9   :  { %2693 = vmatprep.subr.mxu0 %v1179_v18  ;;  %2728 = vmatprep.subr.mxu1 %v2210_v19 }
 0x3aa   :  { %2694 = vmatpush3.msra.mxu0 %v1179_v18  ;;  %2729 = vmatpush3.msra.mxu1 %v2210_v19  ;;  %v3628_v19 = vld [vmem:[#allocation11 + $0x78] sm:$0xff] }
 0x3ab   :  { %2695 = vmatprep.subr.mxu0 %v1178_v20  ;;  %2730 = vmatprep.subr.mxu1 %v2209_v21 }
 0x3ac   :  { %2696 = vmatpush3.msra.mxu0 %v1178_v20  ;;  %2731 = vmatpush3.msra.mxu1 %v2209_v21  ;;  %v3631_v20 = vld [vmem:[#allocation11 + $0x70] sm:$0xff]  ;;  %v3635_v21 = vld [vmem:[#allocation11 + $0x68] sm:$0xff] }
 0x3ad   :  { %2697 = vmatprep.subr.mxu0 %v1177_v23  ;;  %2732 = vmatprep.subr.mxu1 %v2208_v24 }
 0x3ae   :  { %2698 = vmatpush3.msra.mxu0 %v1177_v23  ;;  %2733 = vmatpush3.msra.mxu1 %v2208_v24  ;;  %v3639_v23 = vld [vmem:[#allocation11 + $0x60] sm:$0xff]  ;;  %v3643_v24 = vld [vmem:[#allocation11 + $0x58] sm:$0xff] }
 0x3af   :  { %2699 = vmatprep.subr.mxu0 %v1176_v25  ;;  %2734 = vmatprep.subr.mxu1 %v2207_v26 }
 0x3b0   :  { %2700 = vmatpush3.msra.mxu0 %v1176_v25  ;;  %2735 = vmatpush3.msra.mxu1 %v2207_v26  ;;  %v3647_v25 = vld [vmem:[#allocation11 + $0x50] sm:$0xff]  ;;  %v3651_v26 = vld [vmem:[#allocation11 + $0x48] sm:$0xff] }
 0x3b1   :  { %2701 = vmatprep.subr.mxu0 %v1175_v27  ;;  %2736 = vmatprep.subr.mxu1 %v2206_v28 }
 0x3b2   :  { %2702 = vmatpush3.msra.mxu0 %v1175_v27  ;;  %2737 = vmatpush3.msra.mxu1 %v2206_v28  ;;  %v3655_v27 = vld [vmem:[#allocation11 + $0x40] sm:$0xff]  ;;  %v3659_v28 = vld [vmem:[#allocation11 + $0x38] sm:$0xff] }
 0x3b3   :  { %2703 = vmatprep.subr.mxu0 %v1174_v29  ;;  %2738 = vmatprep.subr.mxu1 %v2205_v30 }
 0x3b4   :  { %2704 = vmatpush3.msra.mxu0 %v1174_v29  ;;  %2739 = vmatpush3.msra.mxu1 %v2205_v30  ;;  %v3663_v29 = vld [vmem:[#allocation11 + $0x30] sm:$0xff]  ;;  %v1361_v30 = vld [vmem:[#allocation11 + $0x28] sm:$0xff] }
 0x3b5   :  { %2705 = vmatprep.subr.mxu0 %v1173_v31  ;;  %2740 = vmatprep.subr.mxu1 %v2204_v32 }
 0x3b6   :  { %2706 = vmatpush3.msra.mxu0 %v1173_v31  ;;  %2741 = vmatpush3.msra.mxu1 %v2204_v32  ;;  %v1360_v31 = vld [vmem:[#allocation11 + $0x20] sm:$0xff]  ;;  %v1359_v32 = vld [vmem:[#allocation11 + $0x18] sm:$0xff] }
 0x3b7   :  { %2707 = vmatprep.subr.mxu0 %v1172_v33  ;;  %2742 = vmatprep.subr.mxu1 %v2203_v34 }
 0x3b8   :  { %2708 = vmatpush3.msra.mxu0 %v1172_v33  ;;  %2743 = vmatpush3.msra.mxu1 %v2203_v34  ;;  %v1358_v33 = vld [vmem:[#allocation11 + $0x10] sm:$0xff]  ;;  %v1357_v34 = vld [vmem:[#allocation11 + $0x8] sm:$0xff] }
 0x3b9   :  { %2709 = vmatprep.subr.mxu0 %v1171_v35  ;;  %2744 = vmatprep.subr.mxu1 %v2202_v36 }
 0x3ba   :  { %2710 = vmatpush3.msra.mxu0 %v1171_v35  ;;  %2745 = vmatpush3.msra.mxu1 %v2202_v36 }
 0x3bb   :  { %2763 = vmatprep.subr.mxu0 %v2231_v37 }
 0x45a   :  { %v2667_v38 = vpop.f32.mrf.mxu0  ;;  %v2678_v39 = vpop.f32.mrf.mxu1 }
 0x45b   :  { %v1170_v43 = vmax.f32 %v2667_v38, %v2678_v39 }
 0x45c   :  { %v1076_v40 = vpop.f32.mrf.mxu0  ;;  %v1160_v41 = vpop.f32.mrf.mxu1 }
 0x45d   :  { %v1169_v42 = vmax.f32 %v1076_v40, %v1160_v41  ;;  %v2246_v40 = vld [vmem:[%s3749_s10] ss:$0 sm:$0xff] }
 0x45f   :  { %2711 = vmatprep.mubr.f32.mxu0 %v1169_v42  ;;  %2746 = vmatprep.mubr.f32.mxu1 %v1169_v42 }
 0x460   :  { %2712 = vmatmul.mubr.f32.vlgmr.msra.gmra.mxu0 %v1170_v43  ;;  %2747 = vmatmul.mubr.f32.vlgmr.msra.gmra.mxu1 %v1170_v43 }
 0x461   :  { %2764 = vmatpush3.msra.mxu0 %v2231_v37  ;;  %2753 = vmatprep.mubr.msk.f32.mxu1 %vm1379_vm3, %v1377_v53 }
 0x462   :  { %2765 = vmatprep.subr.mxu0 %v2230_v45 }
 0x463   :  { %2766 = vmatpush3.msra.mxu0 %v2230_v45 }
 0x464   :  { %2767 = vmatprep.subr.mxu0 %v2229_v47 }
 0x465   :  { %2768 = vmatpush3.msra.mxu0 %v2229_v47 }
 0x466   :  { %2769 = vmatprep.subr.mxu0 %v2228_v48 }
 0x467   :  { %2770 = vmatpush3.msra.mxu0 %v2228_v48 }
 0x468   :  { %2771 = vmatprep.subr.mxu0 %v2227_v49 }
 0x469   :  { %2772 = vmatpush3.msra.mxu0 %v2227_v49 }
 0x46a   :  { %2773 = vmatprep.subr.mxu0 %v2226_v50 }
 0x46b   :  { %2774 = vmatpush3.msra.mxu0 %v2226_v50 }
 0x46c   :  { %2775 = vmatprep.subr.mxu0 %v2225_v51 }
 0x46d   :  { %2776 = vmatpush3.msra.mxu0 %v2225_v51 }
 0x46e   :  { %2777 = vmatprep.subr.mxu0 %v2224_v52 }
 0x46f   :  { %2778 = vmatpush3.msra.mxu0 %v2224_v52 }
 0x470   :  { %2801 = vmatprep.subr.mxu0 %v2243_v54 }
 0x520   :  { %v2713_v55 = vpop.f32.mrf.mxu0  ;;  %v2748_v56 = vpop.f32.mrf.mxu1 }
 0x521   :  { %v1355_v57 = vmax.f32 %v2713_v55, %v2748_v56 }
 0x522   :  { %v1253_v58 = vpop.f32.mrf.mxu0  ;;  %v1345_v59 = vpop.f32.mrf.mxu1 }
 0x523   :  { %v1354_v60 = vmax.f32 %v1253_v58, %v1345_v59  ;;  %2749 = vmatprep.subr.mxu1 %v1355_v57 }
 0x524   :  { %2750 = vmatpush3.msra.mxu1 %v1355_v57 }
 0x525   :  { %2751 = vmatprep.subr.mxu1 %v1354_v60  ;;  %2779 = vmatprep.mubr.msk.f32.mxu0 %vm367_vm1, %v1354_v60 }
 0x526   :  { %2752 = vmatpush3.msra.mxu1 %v1354_v60  ;;  %2780 = vmatmul.mubr.msk.f32.vlgmr.msra.gmra.mxu0 %vm367_vm1, %v1355_v57 }
 0x527   :  { %2754 = vmatmul.mubr.msk.f32.vlgmr.msra.gmra.mxu1 %vm1379_vm3, %v1378_v61  ;;  %2756 = vmatprep.subr.mxu1 %v1355_v57 }
 0x528   :  { %2757 = vmatpush3.msra.mxu1 %v1355_v57  ;;  %2760 = vmatprep.mubr.msk.f32.mxu1 %vm1379_vm3, %v1462_v62 }
 0x529   :  { %2758 = vmatprep.subr.mxu1 %v1354_v60  ;;  %2802 = vmatpush3.msra.mxu0 %v2243_v54 }
 0x52a   :  { %2759 = vmatpush3.msra.mxu1 %v1354_v60  ;;  %2803 = vmatprep.subr.mxu0 %v2242_v63 }
 0x52b   :  { %2761 = vmatmul.mubr.msk.f32.vlgmr.msra.gmra.mxu1 %vm1379_vm3, %v1463_v0  ;;  %2782 = vmatprep.subr.mxu1 %v1552_v1 }
 0x52c   :  { %2783 = vmatpush3.msra.mxu1 %v1552_v1  ;;  %2804 = vmatpush3.msra.mxu0 %v2242_v63 }
 0x52d   :  { %2784 = vmatprep.subr.mxu1 %v1551_v2  ;;  %2805 = vmatprep.subr.mxu0 %v2241_v3 }
 0x52e   :  { %2785 = vmatpush3.msra.mxu1 %v1551_v2  ;;  %2806 = vmatpush3.msra.mxu0 %v2241_v3  ;;  %v2219_v3 = vld [vmem:[%s3749_s10 + $0x2] sm:$0x1] }
 0x52f   :  { %2786 = vmatprep.subr.mxu1 %v1550_v4  ;;  %2807 = vmatprep.subr.mxu0 %v2240_v5 }
 0x530   :  { %2787 = vmatpush3.msra.mxu1 %v1550_v4  ;;  %2808 = vmatpush3.msra.mxu0 %v2240_v5 }
 0x531   :  { %2788 = vmatprep.subr.mxu1 %v1549_v6  ;;  %2809 = vmatprep.subr.mxu0 %v2239_v10 }
 0x532   :  { %2789 = vmatpush3.msra.mxu1 %v1549_v6  ;;  %2810 = vmatpush3.msra.mxu0 %v2239_v10 }
 0x533   :  { %2790 = vmatprep.subr.mxu1 %v1548_v7  ;;  %2811 = vmatprep.subr.mxu0 %v2238_v12 }
 0x534   :  { %2791 = vmatpush3.msra.mxu1 %v1548_v7  ;;  %2812 = vmatpush3.msra.mxu0 %v2238_v12 }
 0x535   :  { %2792 = vmatprep.subr.mxu1 %v1547_v8  ;;  %2813 = vmatprep.subr.mxu0 %v2237_v13 }
 0x536   :  { %2793 = vmatpush3.msra.mxu1 %v1547_v8  ;;  %2814 = vmatpush3.msra.mxu0 %v2237_v13 }
 0x537   :  { %2794 = vmatprep.subr.mxu1 %v1546_v9  ;;  %2815 = vmatprep.subr.mxu0 %v2236_v14 }
 0x538   :  { %2795 = vmatpush3.msra.mxu1 %v1546_v9  ;;  %2816 = vmatpush3.msra.mxu0 %v2236_v14 }
 0x539   :  { %2796 = vmatprep.subr.mxu1 %v1545_v11  ;;  %2869 = vmatprep.subr.mxu0 %v3078_v44 }
 0x53a   :  { %2797 = vmatpush3.msra.mxu1 %v1545_v11 }
 0x53b   :  { %2820 = vmatprep.subr.mxu1 %v3078_v44 }
 0x5e6   :  { %v2781_v35 = vpop.f32.mrf.mxu0 }
 0x5e7   :  { %v2755_v15 = vpop.f32.mrf.mxu1 }
 0x5e8   :  { %v1634_v37 = vpop.f32.mrf.mxu0 }
 0x5e9   :  { %v1452_v16 = vpop.f32.mrf.mxu1 }
 0x5ea   :  { %2798 = vmatprep.mubr.msk.f32.mxu1 %vm367_vm1, %v1452_v16 }
 0x5eb   :  { %v2762_v17 = vpop.f32.mrf.mxu1  ;;  %2799 = vmatmul.mubr.msk.f32.vlgmr.msra.gmra.mxu1 %vm367_vm1, %v2755_v15 }
 0x5ec   :  { %2824 = vmatprep.mubr.msk.f32.mxu1 %vm3079_vm2, %v3078_v44 }
 0x5ed   :  { %v1536_v18 = vpop.f32.mrf.mxu1 }
 0x5ee   :  { %2817 = vmatprep.mubr.msk.f32.mxu0 %vm367_vm1, %v1536_v18 }
 0x5ef   :  { %2818 = vmatmul.mubr.msk.f32.vlgmr.msra.gmra.mxu0 %vm367_vm1, %v2762_v17 }
 0x5f0   :  { %2901 = vmatprep.mubr.msk.f32.mxu0 %vm3079_vm2, %v3078_v44  ;;  %2870 = vmatpush3.msra.mxu0 %v3628_v19 }
 0x5f1   :  { %2871 = vmatprep.subr.mxu0 %v3078_v44 }
 0x5f2   :  { %2872 = vmatpush3.msra.mxu0 %v3631_v20 }
 0x5f3   :  { %2873 = vmatprep.subr.mxu0 %v3078_v44 }
 0x5f4   :  { %2874 = vmatpush3.msra.mxu0 %v3635_v21 }
 0x5f5   :  { %2875 = vmatprep.subr.mxu0 %v3078_v44 }
 0x5f6   :  { %2876 = vmatpush3.msra.mxu0 %v3639_v23 }
 0x5f7   :  { %2877 = vmatprep.subr.mxu0 %v3078_v44 }
 0x5f8   :  { %2878 = vmatpush3.msra.mxu0 %v3643_v24 }
 0x5f9   :  { %2879 = vmatprep.subr.mxu0 %v3078_v44 }
 0x5fa   :  { %2880 = vmatpush3.msra.mxu0 %v3647_v25 }
 0x5fb   :  { %2881 = vmatprep.subr.mxu0 %v3078_v44 }
 0x5fc   :  { %2882 = vmatpush3.msra.mxu0 %v3651_v26 }
 0x5fd   :  { %2883 = vmatprep.subr.mxu0 %v3078_v44 }
 0x5fe   :  { %2884 = vmatpush3.msra.mxu0 %v3655_v27 }
 0x5ff   :  { %2885 = vmatprep.subr.mxu0 %v3078_v44 }
 0x600   :  { %2886 = vmatpush3.msra.mxu0 %v3659_v28 }
 0x601   :  { %2887 = vmatprep.subr.mxu0 %v3078_v44 }
 0x602   :  { %2888 = vmatpush3.msra.mxu0 %v3663_v29 }
 0x603   :  { %2889 = vmatprep.subr.mxu0 %v3078_v44 }
 0x604   :  { %2890 = vmatpush3.msra.mxu0 %v1361_v30 }
 0x605   :  { %2891 = vmatprep.subr.mxu0 %v3078_v44 }
 0x606   :  { %2892 = vmatpush3.msra.mxu0 %v1360_v31 }
 0x607   :  { %2893 = vmatprep.subr.mxu0 %v3078_v44 }
 0x608   :  { %2894 = vmatpush3.msra.mxu0 %v1359_v32 }
 0x609   :  { %2895 = vmatprep.subr.mxu0 %v3078_v44 }
 0x60a   :  { %2896 = vmatpush3.msra.mxu0 %v1358_v33 }
 0x60b   :  { %2897 = vmatprep.subr.mxu0 %v3078_v44 }
 0x60c   :  { %2898 = vmatpush3.msra.mxu0 %v1357_v34 }
 0x60d   :  { %2899 = vmatprep.subr.mxu0 %v3078_v44 }
 0x6ab   :  { %v2800_v36 = vpop.f32.mrf.mxu1 }
 0x6ac   :  { %v1721_v39 = vadd.f32 %v2800_v36, %v2781_v35 }
 0x6ad   :  { %v1715_v38 = vpop.f32.mrf.mxu1 }
 0x6ae   :  { %v1716_v42 = vadd.f32 %v1715_v38, %v1634_v37 }
 0x6af   :  { %v2819_v41 = vpop.f32.mrf.mxu0 }
 0x6b0   :  { %v1815_v43 = vadd.f32 %v2819_v41, %v1721_v39 }
 0x6b1   :  { %v1805_v45 = vpop.f32.mrf.mxu0 }
 0x6b2   :  { %v3676_v47 = vadd.f32 %v2246_v40, %v1815_v43  ;;  %v1814_v48 = vadd.f32 %v1805_v45, %v1716_v42 }
 0x6b4   :  { %v3678_v49 = vadd.f32 %v2246_v40, %v1814_v48  ;;  %2821 = vmatpush3.msra.mxu1 %v3676_v47  ;;  %v1897_v50 = vmul.f32 %v3676_v47, %v3676_v47 }
 0x6b5   :  { %2822 = vmatprep.subr.mxu1 %v3078_v44 }
 0x6b6   :  { %2823 = vmatpush3.msra.mxu1 %v3678_v49  ;;  %v1896_v51 = vmul.f32 %v3678_v49, %v3678_v49 }
 0x6b7   :  { %2825 = vmatmul.mubr.msk.f32.vlgmr.msra.gmra.mxu1 %vm1379_vm3, %v3080_v22  ;;  %2827 = vmatprep.subr.mxu1 %v3078_v44 }
 0x6b8   :  { %2828 = vmatpush3.msra.mxu1 %v1897_v50  ;;  %2831 = vmatprep.mubr.msk.f32.mxu1 %vm3079_vm2, %v3078_v44 }
 0x6b9   :  { %2829 = vmatprep.subr.mxu1 %v3078_v44 }
 0x6ba   :  { %2830 = vmatpush3.msra.mxu1 %v1896_v51 }
 0x6bb   :  { %2832 = vmatmul.mubr.msk.f32.vlgmr.msra.gmra.mxu1 %vm1379_vm3, %v3080_v22  ;;  %2834 = vmatprep.subr.mxu1 %v3078_v44  ;;  %v1356_v22 = vld [vmem:[#allocation11] sm:$0xff] }
 0x6bc   :  { %2835 = vmatpush3.msra.mxu1 %v3628_v19  ;;  %2866 = vmatprep.mubr.msk.f32.mxu1 %vm3079_vm2, %v3078_v44 }
 0x6bd   :  { %2836 = vmatprep.subr.mxu1 %v3078_v44  ;;  %2900 = vmatpush3.msra.mxu0 %v1356_v22 }
 0x6be   :  { %2837 = vmatpush3.msra.mxu1 %v3631_v20 }
 0x6bf   :  { %2838 = vmatprep.subr.mxu1 %v3078_v44 }
 0x6c0   :  { %2839 = vmatpush3.msra.mxu1 %v3635_v21 }
 0x6c1   :  { %2840 = vmatprep.subr.mxu1 %v3078_v44 }
 0x6c2   :  { %2841 = vmatpush3.msra.mxu1 %v3639_v23 }
 0x6c3   :  { %2842 = vmatprep.subr.mxu1 %v3078_v44 }
 0x6c4   :  { %2843 = vmatpush3.msra.mxu1 %v3643_v24 }
 0x6c5   :  { %2844 = vmatprep.subr.mxu1 %v3078_v44 }
 0x6c6   :  { %2845 = vmatpush3.msra.mxu1 %v3647_v25 }
 0x6c7   :  { %2846 = vmatprep.subr.mxu1 %v3078_v44 }
 0x6c8   :  { %2847 = vmatpush3.msra.mxu1 %v3651_v26 }
 0x6c9   :  { %2848 = vmatprep.subr.mxu1 %v3078_v44 }
 0x6ca   :  { %2849 = vmatpush3.msra.mxu1 %v3655_v27 }
 0x6cb   :  { %2850 = vmatprep.subr.mxu1 %v3078_v44 }
 0x6cc   :  { %2851 = vmatpush3.msra.mxu1 %v3659_v28 }
 0x6cd   :  { %2852 = vmatprep.subr.mxu1 %v3078_v44 }
 0x6ce   :  { %2853 = vmatpush3.msra.mxu1 %v3663_v29 }
 0x6cf   :  { %2854 = vmatprep.subr.mxu1 %v3078_v44 }
 0x6d0   :  { %2855 = vmatpush3.msra.mxu1 %v1361_v30 }
 0x6d1   :  { %2856 = vmatprep.subr.mxu1 %v3078_v44 }
 0x6d2   :  { %2857 = vmatpush3.msra.mxu1 %v1360_v31 }
 0x6d3   :  { %2858 = vmatprep.subr.mxu1 %v3078_v44 }
 0x6d4   :  { %2859 = vmatpush3.msra.mxu1 %v1359_v32 }
 0x6d5   :  { %2860 = vmatprep.subr.mxu1 %v3078_v44 }
 0x6d6   :  { %2861 = vmatpush3.msra.mxu1 %v1358_v33 }
 0x6d7   :  { %2862 = vmatprep.subr.mxu1 %v3078_v44 }
 0x6d8   :  { %2863 = vmatpush3.msra.mxu1 %v1357_v34 }
 0x6d9   :  { %2864 = vmatprep.subr.mxu1 %v3078_v44  ;;  %v2218_v44 = vld [vmem:[%s3749_s10 + $0x1] sm:$0x1]  ;;  %s3040_s10 = scalar_lea.vmem %s2143_s6, 256 }
 0x6da   :  { %2865 = vmatpush3.msra.mxu1 %v1356_v22  ;;  %p3041_p2 = scmp.ne.s32.totalorder %s2143_s6, %s3040_s10  ;;  %p3046_p4 = scmp.lt.s32.totalorder %s3040_s10, %s3040_s10 }
 0x6dc   :  { %p3047_p5 = por %p3046_p4, %p3045_p3 }
 0x6de   :  { %p3048_p6 = pnand %p3047_p5, %p3041_p2 }
 0x777   :  { %v1892_v52 = vpop.f32.mrf.mxu1 }
 0x778   :  { %2867 = vmatmul.mubr.f32.vlgmr.msra.gmra.mxu1 %v1892_v52 }
 0x779   :  { %v2826_v53 = vpop.f32.mrf.mxu1 }
 0x77b   :  { %v1964_v54 = vpop.f32.mrf.mxu1 }
 0x77c   :  { %2902 = vmatmul.mubr.f32.vlgmr.msra.gmra.mxu0 %v1964_v54 }
 0x77d   :  { %v2833_v55 = vpop.f32.mrf.mxu1 }
 0x838   :  { %v2034_v56 = vpop.f32.mrf.mxu1 }
 0x839   :  { %v2038_v57 = vmul.f32 0.0078125, %v2034_v56 }
 0x83a   :  { %v2868_v58 = vpop.f32.mrf.mxu1 }
 0x83b   :  { %v2110_v60 = vmul.f32 %v2038_v57, %v2038_v57 }
 0x83c   :  { %v2105_v59 = vpop.f32.mrf.mxu0 }
 0x83d   :  { %v2109_v61 = vmul.f32 0.0078125, %v2105_v59 }
 0x83e   :  { %v2903_v62 = vpop.f32.mrf.mxu0 }
 0x83f   :  { %v2111_v63 = vsub.f32 %v2109_v61, %v2110_v60 }
 0x841   :  { %v2112_v0 = vadd.f32 1e-05, %v2111_v63 }
 0x843   :  { %2918 = vrsqrt.f32 %v2112_v0 }
 0x850   :  { %v2919_v1 = vpop.eup %2918 }
 0x851   :  { %v2114_v2 = vmul.f32 %v2919_v1, %v2218_v44 }
 0x853   :  { %v2115_v4 = vmul.f32 %v2114_v2, %v2038_v57  ;;  %v2121_v5 = vrot.slane %v2114_v2, %v3431_v46 }
 0x855   :  { %v2116_v6 = vsub.f32 %v2219_v3, %v2115_v4  ;;  %v2123_v7 = vmul.f32 %v2121_v5, %v3678_v49  ;;  %v2124_v8 = vmul.f32 %v2121_v5, %v3676_v47 }
 0x857   :  { %v2129_v9 = vrot.slane %v2116_v6, %v3431_v46 }
 0x859   :  { %v2131_v10 = vadd.f32 %v2129_v9, %v2123_v7  ;;  %v2132_v11 = vadd.f32 %v2129_v9, %v2124_v8 }
 0x85b   :  { %v2133_v12 = vmax.f32 %v2131_v10, 0.0  ;;  %v2134_v13 = vmax.f32 %v2132_v11, 0.0 }
 0x85d   :  { %2135 = vst [vmem:[#allocation13] sm:$0xff] %v2133_v12  ;;  %2136 = vst [vmem:[#allocation13 + $0x8] sm:$0xff] %v2134_v13 }
 0x85e   :  { %3051 = shalt.err (!%p3048_p6)
}
 0x85f   :  { %2148 = dma.vmem_to_hbm [thread:$0]  %s2143_s6, 256, %s3750_s11, [#allocation4], %s3072_s22, %s3072_s22, %s3073_s23  }
 0x860   :  { %3068 = dma.done.wait [#allocation4], 256  }
 0x861   :  { %3069 = vsyncadd [#allocation4], 4294967040 }
 0x862   :  { %2152 = vsyncpa [#allocation3], 1 }
 0x863   :  { %2153 = vsyncpa [#allocation6], 1 }
 0x864   :  { %2154 = vsyncpa [#allocation9], 1 }
 0x865   :  { %2155 = vsyncpa [#allocation12], 1 }
 0x866   :  { %2156 = vsyncpa [#allocation4], 1 }

</bundles_post_ra>
